<compile_context>
chip_gen: v7x
topology: tpu7x:2x2x1
jax: 0.10.0
libtpu: 0.0.40
codegen_flags: <defaults>
</compile_context>

<pallas_src>
import functools
import math

import jax
import jax.numpy as jnp
from jax.experimental import pallas as pl
from jax.experimental.pallas import tpu as pltpu


def _round_up(v, m):
    return ((v + m - 1) // m) * m


def kgcn_kernel(adj_ref, support_ref, b1_ref, wt_ref, b2_ref, out_ref, hbuf_ref,
                *, tm, num_stages, adj_resident):
    s = pl.program_id(0)                      # propagation stage: 0 .. degree
    i = pl.program_id(1)                      # node-row tile
    is_last = s == pl.num_programs(0) - 1
    row0 = pl.multiple_of(i * tm, tm)

    if adj_resident:
        # adj is a constant-index full-array VMEM block; slice the current row tile.
        adj_tile = adj_ref[pl.ds(row0, tm), :]
    else:
        # adj is streamed per grid step as a (tm, Np) row tile.
        adj_tile = adj_ref[...]

    def finish(g):
        if num_stages > 1:
            # Stash a bf16 copy of this tile for the next propagation stage
            # (ping-pong slots).  Skipped on the last stage: dead work.
            @pl.when(jnp.logical_not(is_last))
            def _():
                hbuf_ref[s % 2, pl.ds(row0, tm), :] = g.astype(jnp.bfloat16)

        # Only the final stage writes the (resident, constant-index) output block.
        @pl.when(is_last)
        def _():
            out_ref[pl.ds(row0, tm), :] = (g + b2_ref[...]).astype(out_ref.dtype)

    # Stage 0:  h = relu(adj @ support + b1);  g = h @ W^T
    # (head applied early: adj^d @ (h @ W^T) == (adj^d @ h) @ W^T by associativity,
    #  so every propagation matmul is lane-dense [tm, Np] @ [Np, 128k]).
    @pl.when(s == 0)
    def _():
        h = jnp.dot(adj_tile, support_ref[...],
                    preferred_element_type=jnp.float32) + b1_ref[...]
        h = jnp.maximum(h, 0.0)
        g = jnp.dot(h.astype(jnp.bfloat16), wt_ref[...],
                    preferred_element_type=jnp.float32)
        finish(g)

    # Stages 1..degree:  g = adj @ g_prev   (only traced when degree > 0)
    if num_stages > 1:
        @pl.when(s > 0)
        def _():
            read_slot = (s + 1) % 2           # == (s - 1) % 2
            g_prev = hbuf_ref[read_slot]      # [Np, lane_pad] bf16, written last stage
            g = jnp.dot(adj_tile, g_prev, preferred_element_type=jnp.float32)
            finish(g)


def kgcn_forward(x, adj, wx_weight, wx_bias, w_weight, w_bias, degree, *,
                 tm=None, adj_resident=None, vmem_limit_bytes=None):
    """x: [N, nfeat], adj: [N, N] (dense stand-in for torch.spmm's sparse adj),
    wx_weight: [nfeat, nhidden], wx_bias: [nhidden],
    w_weight: [nclass, nhidden] (PyTorch Linear layout), w_bias: [nclass]."""
    N, nfeat = x.shape
    nhidden = wx_weight.shape[1]
    nclass = w_weight.shape[0]
    lane_pad = _round_up(nclass, 128)                 # lane-dense output width

    # ---- Row-tile selection + node padding (never the old tm=N fallback). ----
    if tm is None:
        tm = 256                                      # review: amortize per-step overhead
    tm = _round_up(max(8, min(int(tm), _round_up(N, 8))), 8)
    Np = _round_up(N, tm)                             # zero-pad nodes up to the tile
    num_stages = degree + 1
    hbuf_rows = Np if degree > 0 else 8               # hbuf unused when degree == 0

    # ---- Explicit VMEM budgeting (conservative 2x per operand for double-buffers). ----
    try:
        vmem_cap = int(pltpu.get_tpu_info().vmem_capacity_bytes)
    except Exception:
        vmem_cap = 64 * 1024 * 1024                   # v7x per-core VMEM (smallest gen)
    budget = int(vmem_cap * 0.8)

    def _need(adj_res, tm_):
        adj_b = 2 * 2 * (Np * Np if adj_res else tm_ * Np)        # bf16, 2 buffers
        support_b = 2 * 2 * Np * nhidden                          # bf16, resident
        wt_b = 2 * 2 * nhidden * lane_pad                         # bf16, resident
        bias_b = 2 * 4 * 8 * (nhidden + lane_pad)                 # (1,k) pads to 8 sublanes
        out_b = 2 * 4 * Np * lane_pad                             # f32 resident output
        hbuf_b = 2 * hbuf_rows * lane_pad * 2                     # bf16 ping-pong scratch
        return adj_b + support_b + wt_b + bias_b + out_b + hbuf_b

    if adj_resident is None:
        adj_resident = _need(True, tm) <= budget
    if not adj_resident:
        # Shrink the row tile if the streamed footprint still overshoots the budget.
        while _need(False, tm) > budget and tm >= 16 and tm % 16 == 0:
            tm //= 2
    num_tiles = Np // tm

    if vmem_limit_bytes is None:
        need = _need(adj_resident, tm)
        vmem_limit_bytes = int(max(32 * 1024 * 1024,
                                   min(int(vmem_cap * 0.95), need + (16 << 20))))

    # ---- Host-side prep (hoisted out of the kernel). ----
    # support = x @ Wx computed once by XLA in f32, then cast to the bf16 MXU operand.
    support = jnp.dot(x.astype(jnp.float32), wx_weight.astype(jnp.float32))
    support_bf = jnp.zeros((Np, nhidden), jnp.bfloat16).at[:N, :].set(
        support.astype(jnp.bfloat16))

    # Zero-padded bf16 adjacency: padded rows/cols are zero, so valid outputs are exact.
    adj_bf = jnp.zeros((Np, Np), jnp.bfloat16).at[:N, :N].set(adj.astype(jnp.bfloat16))

    # Lane-dense head: W^T / bias zero-padded to `lane_pad` output lanes.
    wt = jnp.zeros((nhidden, lane_pad), jnp.bfloat16).at[:, :nclass].set(
        w_weight.T.astype(jnp.bfloat16))
    b2 = jnp.zeros((1, lane_pad), jnp.float32).at[:, :nclass].set(
        w_bias.astype(jnp.float32).reshape(1, -1))
    b1 = wx_bias.astype(jnp.float32).reshape(1, -1)

    kernel = functools.partial(kgcn_kernel, tm=tm, num_stages=num_stages,
                               adj_resident=adj_resident)

    if adj_resident:
        adj_spec = pl.BlockSpec((Np, Np), lambda s, i: (0, 0))     # loaded once, resident
    else:
        adj_spec = pl.BlockSpec((tm, Np), lambda s, i: (i, 0))     # streamed row tile

    out_padded = pl.pallas_call(
        kernel,
        out_shape=jax.ShapeDtypeStruct((Np, lane_pad), jnp.float32),
        grid=(num_stages, num_tiles),
        in_specs=[
            adj_spec,                                               # adj (bf16)
            pl.BlockSpec((Np, nhidden), lambda s, i: (0, 0)),       # support = x @ Wx
            pl.BlockSpec((1, nhidden), lambda s, i: (0, 0)),        # GC bias
            pl.BlockSpec((nhidden, lane_pad), lambda s, i: (0, 0)), # W^T (padded)
            pl.BlockSpec((1, lane_pad), lambda s, i: (0, 0)),       # head bias (padded)
        ],
        # Single resident output block: written only on the final stage, one HBM writeback.
        out_specs=pl.BlockSpec((Np, lane_pad), lambda s, i: (0, 0)),
        scratch_shapes=[
            pltpu.VMEM((2, hbuf_rows, lane_pad), jnp.bfloat16),     # ping-pong propagated head
        ],
        compiler_params=pltpu.CompilerParams(
            # Both axes sequential: stage s needs ALL row tiles of stage s-1, and the
            # ping-pong hbuf is core-private.
            dimension_semantics=("arbitrary", "arbitrary"),
            vmem_limit_bytes=vmem_limit_bytes,
        ),
    )(adj_bf, support_bf, b1, wt, b2)

    return out_padded[:N, :nclass]


def reference_forward(x, adj, wx_weight, wx_bias, w_weight, w_bias, degree):
    support = x @ wx_weight
    h = jax.nn.relu(adj @ support + wx_bias)
    for _ in range(degree):
        h = adj @ h
    return h @ w_weight.T + w_bias


def _make_inputs(key, N, nfeat, nhidden, nclass):
    k_x, k_adj, k_wx, k_bx, k_w, k_bw = jax.random.split(key, 6)
    x = jax.random.normal(k_x, (N, nfeat), dtype=jnp.float32)

    # Dense (row-normalized) adjacency standing in for the sparse adj of torch.spmm.
    adj_raw = (jax.random.uniform(k_adj, (N, N)) < 0.05).astype(jnp.float32)
    adj_raw = adj_raw + jnp.eye(N, dtype=jnp.float32)
    adj = adj_raw / jnp.sum(adj_raw, axis=1, keepdims=True)

    # GraphConvolution init: uniform(-stdv, stdv), stdv = 1/sqrt(out_features)
    stdv_gc = 1.0 / math.sqrt(nhidden)
    wx_weight = jax.random.uniform(k_wx, (nfeat, nhidden), minval=-stdv_gc, maxval=stdv_gc)
    wx_bias = jax.random.uniform(k_bx, (nhidden,), minval=-stdv_gc, maxval=stdv_gc)

    # nn.Linear(nhidden, nclass) init: uniform(-1/sqrt(in), 1/sqrt(in))
    stdv_lin = 1.0 / math.sqrt(nhidden)
    w_weight = jax.random.uniform(k_w, (nclass, nhidden), minval=-stdv_lin, maxval=stdv_lin)
    w_bias = jax.random.uniform(k_bw, (nclass,), minval=-stdv_lin, maxval=stdv_lin)
    return x, adj, wx_weight, wx_bias, w_weight, w_bias


def _check(name, out, ref):
    assert out.shape == ref.shape, f"{name}: shape {out.shape} vs {ref.shape}"
    max_err = float(jnp.max(jnp.abs(out - ref)))
    # bf16 matmul operands with f32 accumulation -> relaxed tolerance vs the f32 reference.
    assert jnp.allclose(out, ref, atol=3e-2, rtol=3e-2), (
        f"{name}: mismatch vs. pure-JAX reference, max abs err {max_err}")


if __name__ == "__main__":
    master = jax.random.PRNGKey(0)
    key_a, key_d = jax.random.split(master, 2)

    # Config A: N multiple of the tile, degree=2, auto settings (adj VMEM-resident, tm=256).
    inputs_a = _make_inputs(key_a, 256, 64, 32, 8)
    out = jax.block_until_ready(kgcn_forward(*inputs_a, degree=2))
    _check("resident", out, reference_forward(*inputs_a, 2))

    # Config B: forced streamed adj row tiles (multi-tile grid), same data.
    out = jax.block_until_ready(
        kgcn_forward(*inputs_a, degree=2, tm=128, adj_resident=False))
    _check("streamed", out, reference_forward(*inputs_a, 2))

    # Config C: degree=0 (no propagation stages; hbuf path not traced).
    out = jax.block_until_ready(kgcn_forward(*inputs_a, degree=0))
    _check("degree0", out, reference_forward(*inputs_a, 0))

    # Config D: N not a multiple of the tile -> zero-padded nodes, with one propagation hop.
    inputs_d = _make_inputs(key_d, 200, 48, 32, 10)
    out = jax.block_until_ready(kgcn_forward(*inputs_d, degree=1, tm=128))
    _check("padded", out, reference_forward(*inputs_d, 1))

    print("KERNEL_OK")
</pallas_src>

<mosaic_0001>
module attributes {stable_mosaic.version = 11 : i64} {
  func.func @kgcn_kernel(%arg0: i32, %arg1: i32, %arg2: memref<256x256xbf16, #tpu.memory_space<vmem>>, %arg3: memref<256x32xbf16, #tpu.memory_space<vmem>>, %arg4: memref<1x32xf32, #tpu.memory_space<vmem>>, %arg5: memref<32x128xbf16, #tpu.memory_space<vmem>>, %arg6: memref<1x128xf32, #tpu.memory_space<vmem>>, %arg7: memref<256x128xf32, #tpu.memory_space<vmem>>, %arg8: memref<2x256x128xbf16, #tpu.memory_space<vmem>>) attributes {dimension_semantics = [#tpu.dimension_semantics<arbitrary>, #tpu.dimension_semantics<arbitrary>], iteration_bounds = array<i64: 3, 1>, scalar_prefetch = 0 : i64, scratch_operands = 1 : i64, tpu.core_type = #tpu.core_type<tc>, window_params = [{pipeline_mode = #tpu.pipeline_mode<synchronous>, transform_indices = @transform_0, window_bounds = array<i64: 256, 256>}, {pipeline_mode = #tpu.pipeline_mode<synchronous>, transform_indices = @transform_1, window_bounds = array<i64: 256, 32>}, {pipeline_mode = #tpu.pipeline_mode<synchronous>, transform_indices = @transform_2, window_bounds = array<i64: 1, 32>}, {pipeline_mode = #tpu.pipeline_mode<synchronous>, transform_indices = @transform_3, window_bounds = array<i64: 32, 128>}, {pipeline_mode = #tpu.pipeline_mode<synchronous>, transform_indices = @transform_4, window_bounds = array<i64: 1, 128>}, {pipeline_mode = #tpu.pipeline_mode<synchronous>, transform_indices = @transform_5, window_bounds = array<i64: 256, 128>}]} {
    %c2_i32 = arith.constant 2 : i32
    %0 = arith.cmpi eq, %arg0, %c2_i32 : i32
    %c256_i32 = arith.constant 256 : i32
    %1 = arith.muli %arg1, %c256_i32 : i32
    %2 = tpu.assume_multiple %1, 256 : i32
    %3 = arith.index_cast %2 : i32 to index
    %c0 = arith.constant 0 : index
    %4 = vector.load %arg2[%3, %c0] : memref<256x256xbf16, #tpu.memory_space<vmem>>, vector<256x256xbf16>
    %c0_i32 = arith.constant 0 : i32
    %5 = arith.cmpi eq, %arg0, %c0_i32 : i32
    %6 = arith.extui %5 : i1 to i32
    %c0_i32_0 = arith.constant 0 : i32
    %7 = arith.cmpi ne, %6, %c0_i32_0 : i32
    scf.if %7 {
      %c0_3 = arith.constant 0 : index
      %c0_4 = arith.constant 0 : index
      %11 = vector.load %arg3[%c0_3, %c0_4] : memref<256x32xbf16, #tpu.memory_space<vmem>>, vector<256x32xbf16>
      %cst = arith.constant dense<0.000000e+00> : vector<256x32xf32>
      %12 = tpu.matmul %4, %11, %cst {dimension_numbers = #tpu.dot_dimension_numbers<[1], [0], [0], [1], [0, 0, 1, 1], [], []>} : vector<256x256xbf16>, vector<256x32xbf16>, vector<256x32xf32> -> vector<256x32xf32>
      %c0_5 = arith.constant 0 : index
      %c0_6 = arith.constant 0 : index
      %13 = vector.load %arg4[%c0_5, %c0_6] : memref<1x32xf32, #tpu.memory_space<vmem>>, vector<1x32xf32>
      %14 = vector.broadcast %13 : vector<1x32xf32> to vector<256x32xf32>
      %15 = arith.addf %12, %14 : vector<256x32xf32>
      %cst_7 = arith.constant 0.000000e+00 : f32
      %16 = vector.broadcast %cst_7 : f32 to vector<256x32xf32>
      %17 = arith.maximumf %15, %16 : vector<256x32xf32>
      %18 = arith.truncf %17 : vector<256x32xf32> to vector<256x32xbf16>
      %c0_8 = arith.constant 0 : index
      %c0_9 = arith.constant 0 : index
      %19 = vector.load %arg5[%c0_8, %c0_9] : memref<32x128xbf16, #tpu.memory_space<vmem>>, vector<32x128xbf16>
      %cst_10 = arith.constant dense<0.000000e+00> : vector<256x128xf32>
      %20 = tpu.matmul %18, %19, %cst_10 {dimension_numbers = #tpu.dot_dimension_numbers<[1], [0], [0], [1], [0, 0, 1, 1], [], []>} : vector<256x32xbf16>, vector<32x128xbf16>, vector<256x128xf32> -> vector<256x128xf32>
      %true = arith.constant true
      %21 = arith.xori %0, %true : i1
      %22 = arith.extui %21 : i1 to i32
      %c0_i32_11 = arith.constant 0 : i32
      %23 = arith.cmpi ne, %22, %c0_i32_11 : i32
      scf.if %23 {
        %26 = arith.truncf %20 : vector<256x128xf32> to vector<256x128xbf16>
        %c2_i32_13 = arith.constant 2 : i32
        %c0_i32_14 = arith.constant 0 : i32
        %27 = arith.cmpi eq, %c2_i32_13, %c0_i32_14 : i32
        %c1_i32 = arith.constant 1 : i32
        %28 = arith.select %27, %c1_i32, %c2_i32_13 : i32
        %29 = arith.remsi %arg0, %28 : i32
        %c0_i32_15 = arith.constant 0 : i32
        %30 = arith.cmpi ne, %29, %c0_i32_15 : i32
        %c0_i32_16 = arith.constant 0 : i32
        %31 = arith.cmpi slt, %29, %c0_i32_16 : i32
        %c0_i32_17 = arith.constant 0 : i32
        %32 = arith.cmpi slt, %28, %c0_i32_17 : i32
        %33 = arith.xori %31, %32 : i1
        %34 = arith.andi %33, %30 : i1
        %35 = arith.addi %29, %28 : i32
        %36 = arith.select %34, %35, %29 : i32
        %37 = arith.index_cast %36 : i32 to index
        %38 = arith.index_cast %2 : i32 to index
        %c0_18 = arith.constant 0 : index
        %39 = vector.load %arg8[%37, %38, %c0_18] : memref<2x256x128xbf16, #tpu.memory_space<vmem>>, vector<1x256x128xbf16>
        %40 = vector.shape_cast %39 : vector<1x256x128xbf16> to vector<256x128xbf16>
        %41 = vector.shape_cast %26 : vector<256x128xbf16> to vector<1x256x128xbf16>
        tpu.vector_store %arg8[%37, %38, %c0_18], %41 {strides = array<i32>} : memref<2x256x128xbf16, #tpu.memory_space<vmem>>, vector<1x256x128xbf16>,
      } else {
      }
      %24 = arith.extui %0 : i1 to i32
      %c0_i32_12 = arith.constant 0 : i32
      %25 = arith.cmpi ne, %24, %c0_i32_12 : i32
      scf.if %25 {
        %c0_13 = arith.constant 0 : index
        %c0_14 = arith.constant 0 : index
        %26 = vector.load %arg6[%c0_13, %c0_14] : memref<1x128xf32, #tpu.memory_space<vmem>>, vector<1x128xf32>
        %27 = vector.broadcast %26 : vector<1x128xf32> to vector<256x128xf32>
        %28 = arith.addf %20, %27 : vector<256x128xf32>
        %29 = arith.index_cast %2 : i32 to index
        %c0_15 = arith.constant 0 : index
        %30 = vector.load %arg7[%29, %c0_15] : memref<256x128xf32, #tpu.memory_space<vmem>>, vector<256x128xf32>
        tpu.vector_store %arg7[%29, %c0_15], %28 {strides = array<i32>} : memref<256x128xf32, #tpu.memory_space<vmem>>, vector<256x128xf32>,
      } else {
      }
    } else {
    }
    %c0_i32_1 = arith.constant 0 : i32
    %8 = arith.cmpi sgt, %arg0, %c0_i32_1 : i32
    %9 = arith.extui %8 : i1 to i32
    %c0_i32_2 = arith.constant 0 : i32
    %10 = arith.cmpi ne, %9, %c0_i32_2 : i32
    scf.if %10 {
      %c1_i32 = arith.constant 1 : i32
      %11 = arith.addi %arg0, %c1_i32 : i32
      %c2_i32_3 = arith.constant 2 : i32
      %c0_i32_4 = arith.constant 0 : i32
      %12 = arith.cmpi eq, %c2_i32_3, %c0_i32_4 : i32
      %c1_i32_5 = arith.constant 1 : i32
      %13 = arith.select %12, %c1_i32_5, %c2_i32_3 : i32
      %14 = arith.remsi %11, %13 : i32
      %c0_i32_6 = arith.constant 0 : i32
      %15 = arith.cmpi ne, %14, %c0_i32_6 : i32
      %c0_i32_7 = arith.constant 0 : i32
      %16 = arith.cmpi slt, %14, %c0_i32_7 : i32
      %c0_i32_8 = arith.constant 0 : i32
      %17 = arith.cmpi slt, %13, %c0_i32_8 : i32
      %18 = arith.xori %16, %17 : i1
      %19 = arith.andi %18, %15 : i1
      %20 = arith.addi %14, %13 : i32
      %21 = arith.select %19, %20, %14 : i32
      %22 = arith.index_cast %21 : i32 to index
      %c0_9 = arith.constant 0 : index
      %c0_10 = arith.constant 0 : index
      %23 = vector.load %arg8[%22, %c0_9, %c0_10] : memref<2x256x128xbf16, #tpu.memory_space<vmem>>, vector<1x256x128xbf16>
      %24 = vector.shape_cast %23 : vector<1x256x128xbf16> to vector<256x128xbf16>
      %cst = arith.constant dense<0.000000e+00> : vector<256x128xf32>
      %25 = tpu.matmul %4, %24, %cst {dimension_numbers = #tpu.dot_dimension_numbers<[1], [0], [0], [1], [0, 0, 1, 1], [], []>} : vector<256x256xbf16>, vector<256x128xbf16>, vector<256x128xf32> -> vector<256x128xf32>
      %true = arith.constant true
      %26 = arith.xori %0, %true : i1
      %27 = arith.extui %26 : i1 to i32
      %c0_i32_11 = arith.constant 0 : i32
      %28 = arith.cmpi ne, %27, %c0_i32_11 : i32
      scf.if %28 {
        %31 = arith.truncf %25 : vector<256x128xf32> to vector<256x128xbf16>
        %c2_i32_13 = arith.constant 2 : i32
        %c0_i32_14 = arith.constant 0 : i32
        %32 = arith.cmpi eq, %c2_i32_13, %c0_i32_14 : i32
        %c1_i32_15 = arith.constant 1 : i32
        %33 = arith.select %32, %c1_i32_15, %c2_i32_13 : i32
        %34 = arith.remsi %arg0, %33 : i32
        %c0_i32_16 = arith.constant 0 : i32
        %35 = arith.cmpi ne, %34, %c0_i32_16 : i32
        %c0_i32_17 = arith.constant 0 : i32
        %36 = arith.cmpi slt, %34, %c0_i32_17 : i32
        %c0_i32_18 = arith.constant 0 : i32
        %37 = arith.cmpi slt, %33, %c0_i32_18 : i32
        %38 = arith.xori %36, %37 : i1
        %39 = arith.andi %38, %35 : i1
        %40 = arith.addi %34, %33 : i32
        %41 = arith.select %39, %40, %34 : i32
        %42 = arith.index_cast %41 : i32 to index
        %43 = arith.index_cast %2 : i32 to index
        %c0_19 = arith.constant 0 : index
        %44 = vector.load %arg8[%42, %43, %c0_19] : memref<2x256x128xbf16, #tpu.memory_space<vmem>>, vector<1x256x128xbf16>
        %45 = vector.shape_cast %44 : vector<1x256x128xbf16> to vector<256x128xbf16>
        %46 = vector.shape_cast %31 : vector<256x128xbf16> to vector<1x256x128xbf16>
        tpu.vector_store %arg8[%42, %43, %c0_19], %46 {strides = array<i32>} : memref<2x256x128xbf16, #tpu.memory_space<vmem>>, vector<1x256x128xbf16>,
      } else {
      }
      %29 = arith.extui %0 : i1 to i32
      %c0_i32_12 = arith.constant 0 : i32
      %30 = arith.cmpi ne, %29, %c0_i32_12 : i32
      scf.if %30 {
        %c0_13 = arith.constant 0 : index
        %c0_14 = arith.constant 0 : index
        %31 = vector.load %arg6[%c0_13, %c0_14] : memref<1x128xf32, #tpu.memory_space<vmem>>, vector<1x128xf32>
        %32 = vector.broadcast %31 : vector<1x128xf32> to vector<256x128xf32>
        %33 = arith.addf %25, %32 : vector<256x128xf32>
        %34 = arith.index_cast %2 : i32 to index
        %c0_15 = arith.constant 0 : index
        %35 = vector.load %arg7[%34, %c0_15] : memref<256x128xf32, #tpu.memory_space<vmem>>, vector<256x128xf32>
        tpu.vector_store %arg7[%34, %c0_15], %33 {strides = array<i32>} : memref<256x128xf32, #tpu.memory_space<vmem>>, vector<256x128xf32>,
      } else {
      }
    } else {
    }
    return
  }
  func.func @transform_0(%arg0: i32, %arg1: i32) -> (i32, i32) {
    %c0_i32 = arith.constant 0 : i32
    %c0_i32_0 = arith.constant 0 : i32
    %c0_i32_1 = arith.constant 0 : i32
    return %c0_i32, %c0_i32_0 : i32, i32
  }
  func.func @transform_1(%arg0: i32, %arg1: i32) -> (i32, i32) {
    %c0_i32 = arith.constant 0 : i32
    %c0_i32_0 = arith.constant 0 : i32
    %c0_i32_1 = arith.constant 0 : i32
    return %c0_i32, %c0_i32_0 : i32, i32
  }
  func.func @transform_2(%arg0: i32, %arg1: i32) -> (i32, i32) {
    %c0_i32 = arith.constant 0 : i32
    %c0_i32_0 = arith.constant 0 : i32
    %c0_i32_1 = arith.constant 0 : i32
    return %c0_i32, %c0_i32_0 : i32, i32
  }
  func.func @transform_3(%arg0: i32, %arg1: i32) -> (i32, i32) {
    %c0_i32 = arith.constant 0 : i32
    %c0_i32_0 = arith.constant 0 : i32
    %c0_i32_1 = arith.constant 0 : i32
    return %c0_i32, %c0_i32_0 : i32, i32
  }
  func.func @transform_4(%arg0: i32, %arg1: i32) -> (i32, i32) {
    %c0_i32 = arith.constant 0 : i32
    %c0_i32_0 = arith.constant 0 : i32
    %c0_i32_1 = arith.constant 0 : i32
    return %c0_i32, %c0_i32_0 : i32, i32
  }
  func.func @transform_5(%arg0: i32, %arg1: i32) -> (i32, i32) {
    %c0_i32 = arith.constant 0 : i32
    %c0_i32_0 = arith.constant 0 : i32
    %c0_i32_1 = arith.constant 0 : i32
    return %c0_i32, %c0_i32_0 : i32, i32
  }
}

</mosaic_0001>

<bundles_post_ra>
// kernel: tpu_custom_call.1
= control target key start
LH: loop header
LB: loop body
LE: loop exit
PB: predicated region body
PF: predicated region fallthrough
CT: control target
= control target key end

     0   :  { %10 = vsyncpa [#allocation4], 0  ;;  %s3012_s0 = inlined_call_operand.hbm [shape: bf16[256,256], index: 0, kind: input, shape index: {}]   ;;  %s3013_s1 = inlined_call_operand.vmem [shape: bf16[256,32], index: 1, kind: input, shape index: {}]   ;;  %s3014_s2 = inlined_call_operand.vmem [shape: f32[1,32], index: 2, kind: input, shape index: {}]   ;;  %s3015_s3 = inlined_call_operand.vmem [shape: bf16[32,128], index: 3, kind: input, shape index: {}]   ;;  %s3016_s4 = inlined_call_operand.vmem [shape: f32[1,128], index: 4, kind: input, shape index: {}]   ;;  %s3017_s5 = inlined_call_operand.hbm [shape: f32[256,128], index: 5, kind: output, shape index: {}]  }
   0x1   :  { %11 = vsyncpa [#allocation5], 0  ;;  %s2310_s18 = smov 0   ;;  %s2312_s19 = smov 0  }
   0x2   :  { %s2314_s20 = smov 0  }
   0x3 LB: > { %s1680_s21 = sadd.s32 4294967295, %s2272_s20   ;;  %s29_s22 = sadd.s32 1, %s2268_s19  ;;  %s2272_s20 = sphi %s2314_s20, %s17_s20   ;;  %s2268_s19 = sphi %s2312_s19, %s3092_s19   ;;  %s2264_s18 = sphi %s2310_s18, %s3091_s18  }
   0x4   : > { %p31_p0 = scmp.ge.s32.totalorder %s29_s22, 3  ;;  %p1681_p1 = scmp.ge.s32.totalorder %s2272_s20, 1 }
   0x5   : > { %p160_p2 = scmp.lt.s32.totalorder %s2272_s20, 4  ;;  %p2337_p4 = scmp.eq.s32.totalorder %s1680_s21, 0 }
   0x6   : > { %s3094_s22 = smov (%p31_p0, %s29_s22), 0  ;;  %s2274_s25 = smov [#allocation3]  }
   0x7   : > { %p2331_p3 = pnand %p1681_p1, %p160_p2  ;;  %s172_s26 = sshll.u32 %s2274_s25, 4  ;;  %s173_s26 = int_to_ptr.vmem [resolvable:$true] %s172_s26 }
   0x8   : > { %s3054_s24 = scalar_select %p2337_p4, 1, 0 }
   0x9   : > { %s3053_s23 = scalar_select %p2331_p3, 1, 0 }
   0xa   : > { %p2132_p5 = pneg %p2331_p3  ;;  %s2188_s30 = scalar_lea.hbm %s3012_s0, 4096 }
   0xb   : > { %p2189_p7 = scmp.ne.s32.totalorder %s3012_s0, %s2188_s30  ;;  %p2195_p11 = scmp.lt.u32.totalorder %s2188_s30, %s3012_s0 }
   0xc   : > { %p2345_p6 = pnand %p2337_p4, %p2132_p5 }
   0xe   : > { %p2190_p8 = pneg %p2345_p6 }
  0x10   : > { %p2191_p9 = pnand %p2190_p8, %p2189_p7 }
  0x12   : > { %p2192_p10 = pneg %p2191_p9 }
  0x14   : > { %p2197_p12 = pnand %p2195_p11, %p2192_p10 }
  0x16   : > { %2200 = shalt.err (!%p2197_p12)
}
  0x17   : > { %s2201_s10 = scalar_lea.vmem %s173_s26, 4096  ;;  %p2209_p2 = scmp.lt.s32.totalorder %s173_s26, %s173_s26 }
  0x18   : > { %p2202_p13 = scmp.ne.s32.totalorder %s173_s26, %s2201_s10  ;;  %p2210_p5 = scmp.lt.s32.totalorder %s2201_s10, %s2201_s10 }
  0x1a   : > { %p2204_p0 = pnand %p2202_p13, %p2190_p8  ;;  %p2211_p4 = por %p2210_p5, %p2209_p2 }
  0x1c   : > { %p2205_p1 = pneg %p2204_p0 }
  0x1e   : > { %p2212_p3 = pnand %p2211_p4, %p2205_p1 }
  0x20   : > { %2215 = shalt.err (!%p2212_p3)
}
  0x21   : > { %s2275_s11 = smov 128   ;;  %s2276_s12 = smov 8  }
  0x22   : > { %2135 = dma.hbm_to_vmem [thread:$0]  (!%p2345_p6), %s3012_s0, 4096, %s173_s26, [#allocation4], %s2275_s11, %s2275_s11, %s2276_s12  }
  0x23   : > { %p3056_p7 = scmp.ne.s32.totalorder %s3053_s23, 0 }
  0x25   : > { %200 = sbr.rel (%p3056_p7) target bundleno = 1049 (0x419), region = 40 }
  0x2c   : > { %p3057_p9 = scmp.ne.s32.totalorder %s3054_s24, 0 }
  0x2e   : > { %2255 = dma.done.wait (%p3057_p9), [#allocation4], 4096  }
  0x2f   : > { %2257 = vsyncadd (%p3057_p9), [#allocation4], 4294963200  ;;  %v2371_v0 = vld [vmem:[#allocation3] sm:$0xff]  ;;  %v2373_v1 = vld [vmem:[#allocation3 + $0x8] sm:$0xff]  ;;  %p1685_p3 = scmp.ne.s32.totalorder %s2264_s18, 0 }
  0x30   : > { %v2375_v2 = vld [vmem:[#allocation3 + $0x10] sm:$0xff]  ;;  %v2377_v3 = vld [vmem:[#allocation3 + $0x18] sm:$0xff]  ;;  %v2379_v4 = vld [vmem:[#allocation3 + $0x20] sm:$0xff]  ;;  %v1688_v33 = vcombine.high (!%p1685_p3), %v2371_v0, %v2373_v1  ;;  %v1687_v50 = vcombine.low (!%p1685_p3), %v2371_v0, %v2373_v1  ;;  %vm782_vm0 = vcmask (!%p1685_p3), 261120   ;;  %p1753_p4 = scmp.eq.s32.totalorder (!%p1685_p3), %s2264_s18, 2 }
  0x31   : > { %v2381_v5 = vld [vmem:[#allocation3 + $0x28] sm:$0xff]  ;;  %v2383_v6 = vld [vmem:[#allocation3 + $0x30] sm:$0xff]  ;;  %v2385_v7 = vld [vmem:[#allocation3 + $0x38] sm:$0xff]  ;;  %v1690_v51 = vcombine.high (!%p1685_p3), %v2375_v2, %v2377_v3  ;;  %v1689_v54 = vcombine.low (!%p1685_p3), %v2375_v2, %v2377_v3 }
  0x32   : > { %v2387_v8 = vld [vmem:[#allocation3 + $0x40] sm:$0xff]  ;;  %v2389_v9 = vld [vmem:[#allocation3 + $0x48] sm:$0xff]  ;;  %v2391_v10 = vld [vmem:[#allocation3 + $0x50] sm:$0xff]  ;;  %589 = vmatprep.mubr.bf16.mxu0 (!%p1685_p3), %v1688_v33  ;;  %v1692_v55 = vcombine.high (!%p1685_p3), %v2379_v4, %v2381_v5  ;;  %v1691_v58 = vcombine.low (!%p1685_p3), %v2379_v4, %v2381_v5  ;;  %v1694_v59 = vcombine.high (!%p1685_p3), %v2383_v6, %v2385_v7  ;;  %v1693_v62 = vcombine.low (!%p1685_p3), %v2383_v6, %v2385_v7 }
  0x33   : > { %3058 = vst [vmem:[#allocation9_spill] sm:$0xff] %v2387_v8  ;;  %3059 = vst [vmem:[#allocation10_spill] sm:$0xff] %v2389_v9  ;;  %v2393_v11 = vld [vmem:[#allocation3 + $0x58] sm:$0xff]  ;;  %v2395_v12 = vld [vmem:[#allocation3 + $0x60] sm:$0xff]  ;;  %v1696_v63 = vcombine.high (!%p1685_p3), %v2387_v8, %v2389_v9  ;;  %v1695_v33 = vcombine.low (!%p1685_p3), %v2387_v8, %v2389_v9 }
  0x34   : > { %3060 = vst [vmem:[#allocation11_spill] sm:$0xff] %v2391_v10  ;;  %3061 = vst [vmem:[#allocation12_spill] sm:$0xff] %v2393_v11  ;;  %v2397_v13 = vld [vmem:[#allocation3 + $0x68] sm:$0xff]  ;;  %v2399_v14 = vld [vmem:[#allocation3 + $0x70] sm:$0xff] }
  0x35   : > { %3062 = vst [vmem:[#allocation13_spill] sm:$0xff] %v2395_v12  ;;  %3063 = vst [vmem:[#allocation14_spill] sm:$0xff] %v2397_v13  ;;  %v2401_v15 = vld [vmem:[#allocation3 + $0x78] sm:$0xff]  ;;  %v2403_v16 = vld [vmem:[#allocation3 + $0x80] sm:$0xff] }
  0x36   : > { %3064 = vst [vmem:[#allocation15_spill] sm:$0xff] %v2399_v14  ;;  %3065 = vst [vmem:[#allocation16_spill] sm:$0xff] %v2401_v15  ;;  %v2405_v17 = vld [vmem:[#allocation3 + $0x88] sm:$0xff]  ;;  %v2407_v18 = vld [vmem:[#allocation3 + $0x90] sm:$0xff] }
  0x37   : > { %v2409_v19 = vld [vmem:[#allocation3 + $0x98] sm:$0xff]  ;;  %v2411_v20 = vld [vmem:[#allocation3 + $0xa0] sm:$0xff]  ;;  %v2413_v21 = vld [vmem:[#allocation3 + $0xa8] sm:$0xff]  ;;  %261 = sbr.rel (%p1685_p3) target bundleno = 669 (0x29d), region = 48 }
  0x38   : > { %v2415_v22 = vld [vmem:[#allocation3 + $0xb0] sm:$0xff]  ;;  %v2417_v23 = vld [vmem:[#allocation3 + $0xb8] sm:$0xff]  ;;  %v2419_v24 = vld [vmem:[#allocation3 + $0xc0] sm:$0xff] }
  0x39   : > { %3066 = vst [vmem:[#allocation17_spill] sm:$0xff] %v2419_v24  ;;  %v2421_v25 = vld [vmem:[#allocation3 + $0xc8] sm:$0xff]  ;;  %v2423_v26 = vld [vmem:[#allocation3 + $0xd0] sm:$0xff]  ;;  %v2425_v27 = vld [vmem:[#allocation3 + $0xd8] sm:$0xff] }
  0x3a   : > { %3067 = vst [vmem:[#allocation18_spill] sm:$0xff] %v2421_v25  ;;  %3068 = vst [vmem:[#allocation19_spill] sm:$0xff] %v2423_v26  ;;  %v2427_v28 = vld [vmem:[#allocation3 + $0xe0] sm:$0xff]  ;;  %v2429_v29 = vld [vmem:[#allocation3 + $0xe8] sm:$0xff]  ;;  %v1712_v38 = vcombine.high (!%p1685_p3), %v2419_v24, %v2421_v25  ;;  %v1711_v52 = vcombine.low (!%p1685_p3), %v2419_v24, %v2421_v25  ;;  %v1714_v53 = vcombine.high (!%p1685_p3), %v2423_v26, %v2425_v27 }
  0x3b   : > { %3069 = vst [vmem:[#allocation20_spill] sm:$0xff] %v2425_v27  ;;  %3070 = vst [vmem:[#allocation21_spill] sm:$0xff] %v2427_v28  ;;  %v2431_v30 = vld [vmem:[#allocation3 + $0xf0] sm:$0xff]  ;;  %v2433_v31 = vld [vmem:[#allocation3 + $0xf8] sm:$0xff]  ;;  %v1713_v56 = vcombine.low (!%p1685_p3), %v2423_v26, %v2425_v27  ;;  %v1716_v57 = vcombine.high (!%p1685_p3), %v2427_v28, %v2429_v29  ;;  %v1715_v60 = vcombine.low (!%p1685_p3), %v2427_v28, %v2429_v29 }
  0x3c   : > { %3071 = vst [vmem:[#allocation22_spill] sm:$0xff] %v2429_v29  ;;  %3072 = vst [vmem:[#allocation23_spill] sm:$0xff] %v2431_v30  ;;  %v2170_v32 = vld [vmem:[%s3013_s1 + $0x40] sm:$0xff] (!%p1685_p3)   ;;  %v2172_v35 = vld [vmem:[%s3013_s1 + $0x48] sm:$0xff] (!%p1685_p3)   ;;  %685 = vmatprep.mubr.bf16.mxu1 (!%p1685_p3), %v1712_v38  ;;  %v1718_v61 = vcombine.high (!%p1685_p3), %v2431_v30, %v2433_v31  ;;  %v1702_v38 = vcombine.high (!%p1685_p3), %v2399_v14, %v2401_v15 }
  0x3d   : > { %3073 = vst [vmem:[#allocation24_spill] sm:$0xff] %v2433_v31  ;;  %v2171_v34 = vld [vmem:[%s3013_s1] sm:$0xff] (!%p1685_p3)   ;;  %1814 = vmatprep.subr.bf16.mxu0 (!%p1685_p3), %v2170_v32  ;;  %v2173_v36 = vld [vmem:[%s3013_s1 + $0x8] sm:$0xff] (!%p1685_p3)   ;;  %2092 = vmatprep.subr.bf16.mxu1 (!%p1685_p3), %v2170_v32  ;;  %v2174_v37 = vld [vmem:[%s3013_s1 + $0x50] sm:$0xff] (!%p1685_p3)   ;;  %v1717_v32 = vcombine.low (!%p1685_p3), %v2431_v30, %v2433_v31 }
  0x3e   : > { %1815 = vmatpush3.bf16.msra.mxu0 %v2171_v34  ;;  %2100 = vmatpush3.bf16.msra.mxu1 %v2171_v34  ;;  %v2175_v39 = vld [vmem:[%s3013_s1 + $0x10] sm:$0xff]   ;;  %v2176_v40 = vld [vmem:[%s3013_s1 + $0x58] sm:$0xff]   ;;  %v2178_v42 = vld [vmem:[%s3013_s1 + $0x60] sm:$0xff]   ;;  %v1698_v34 = vcombine.high %v2391_v10, %v2393_v11  ;;  %p1012_p6 = scmp.lt.s32.totalorder (!%p1753_p4), %s2264_s18, 0  ;;  %s1013_s13 = ssub.s32 (!%p1753_p4), 0, %s2264_s18 }
  0x3f   : > { %1816 = vmatprep.subr.bf16.mxu0 %v2172_v35  ;;  %2093 = vmatprep.subr.bf16.mxu1 %v2172_v35  ;;  %v2177_v41 = vld [vmem:[%s3013_s1 + $0x18] sm:$0xff]   ;;  %v2179_v43 = vld [vmem:[%s3013_s1 + $0x20] sm:$0xff]   ;;  %v2180_v44 = vld [vmem:[%s3013_s1 + $0x68] sm:$0xff]   ;;  %v1697_v35 = vcombine.low %v2391_v10, %v2393_v11  ;;  %s1754_s14 = smin.u32 (!%p1753_p4), %s2264_s18, %s1013_s13 }
  0x40   : > { %v2181_v45 = vld [vmem:[%s3013_s1 + $0x28] sm:$0xff]   ;;  %v2182_v46 = vld [vmem:[%s3013_s1 + $0x70] sm:$0xff]   ;;  %v2184_v48 = vld [vmem:[%s3013_s1 + $0x78] sm:$0xff]   ;;  %s1015_s15 = sand.u32 (!%p1753_p4), 1, %s1754_s14  }
  0x41   : > { %v2183_v47 = vld [vmem:[%s3013_s1 + $0x30] sm:$0xff]   ;;  %v2185_v49 = vld [vmem:[%s3013_s1 + $0x38] sm:$0xff]   ;;  %s1016_s16 = ssub.s32 (!%p1753_p4), 0, %s1015_s15 }
  0x42   : > { %1817 = vmatpush3.bf16.msra.mxu0 %v2173_v36  ;;  %2101 = vmatpush3.bf16.msra.mxu1 %v2173_v36  ;;  %v1700_v36 = vcombine.high %v2395_v12, %v2397_v13 }
  0x43   : > { %1818 = vmatprep.subr.bf16.mxu0 %v2174_v37  ;;  %2094 = vmatprep.subr.bf16.mxu1 %v2174_v37  ;;  %v1699_v37 = vcombine.low %v2395_v12, %v2397_v13 }
  0x46   : > { %1819 = vmatpush3.bf16.msra.mxu0 %v2175_v39  ;;  %2102 = vmatpush3.bf16.msra.mxu1 %v2175_v39  ;;  %v1701_v39 = vcombine.low %v2399_v14, %v2401_v15 }
  0x47   : > { %1820 = vmatprep.subr.bf16.mxu0 %v2176_v40  ;;  %2095 = vmatprep.subr.bf16.mxu1 %v2176_v40  ;;  %v1704_v40 = vcombine.high %v2403_v16, %v2405_v17 }
  0x4a   : > { %1821 = vmatpush3.bf16.msra.mxu0 %v2177_v41  ;;  %2103 = vmatpush3.bf16.msra.mxu1 %v2177_v41  ;;  %v1703_v41 = vcombine.low %v2403_v16, %v2405_v17 }
  0x4b   : > { %1822 = vmatprep.subr.bf16.mxu0 %v2178_v42  ;;  %2096 = vmatprep.subr.bf16.mxu1 %v2178_v42  ;;  %v1706_v42 = vcombine.high %v2407_v18, %v2409_v19 }
  0x4e   : > { %1823 = vmatpush3.bf16.msra.mxu0 %v2179_v43  ;;  %2104 = vmatpush3.bf16.msra.mxu1 %v2179_v43  ;;  %v1705_v43 = vcombine.low %v2407_v18, %v2409_v19 }
  0x4f   : > { %1824 = vmatprep.subr.bf16.mxu0 %v2180_v44  ;;  %2097 = vmatprep.subr.bf16.mxu1 %v2180_v44  ;;  %v1708_v44 = vcombine.high %v2411_v20, %v2413_v21 }
  0x52   : > { %1825 = vmatpush3.bf16.msra.mxu0 %v2181_v45  ;;  %2105 = vmatpush3.bf16.msra.mxu1 %v2181_v45  ;;  %v1707_v45 = vcombine.low %v2411_v20, %v2413_v21 }
  0x53   : > { %1826 = vmatprep.subr.bf16.mxu0 %v2182_v46  ;;  %2098 = vmatprep.subr.bf16.mxu1 %v2182_v46  ;;  %v1710_v46 = vcombine.high %v2415_v22, %v2417_v23 }
  0x56   : > { %1827 = vmatpush3.bf16.msra.mxu0 %v2183_v47  ;;  %2106 = vmatpush3.bf16.msra.mxu1 %v2183_v47  ;;  %v1709_v47 = vcombine.low %v2415_v22, %v2417_v23 }
  0x57   : > { %1828 = vmatprep.subr.bf16.mxu0 %v2184_v48  ;;  %2099 = vmatprep.subr.bf16.mxu1 %v2184_v48  ;;  %v2186_v48 = vld [vmem:[%s3015_s3] sm:$0xff]  }
  0x5a   : > { %1829 = vmatpush3.bf16.msra.mxu0 %v2185_v49  ;;  %2107 = vmatpush3.bf16.msra.mxu1 %v2185_v49  ;;  %v2187_v49 = vld [vmem:[%s3015_s3 + $0x8] sm:$0xff]  }
  0x5b   : > { %2056 = vmatprep.subr.bf16.mxu1 %v2186_v48 }
  0x5d   : > { %590 = vmatmul.mubr.bf16.vlgmr.msra.gmra.mrb[0].mxu0 %v1687_v50  ;;  %686 = vmatmul.mubr.bf16.vlgmr.msra.gmra.mrb[0].mxu1 %v1711_v52 }
  0x5e   : > { %597 = vmatprep.mubr.bf16.mxu0 %v1690_v51  ;;  %693 = vmatprep.mubr.bf16.mxu1 %v1714_v53  ;;  %v2557_v51 = vld [vmem:[%s3014_s2] ss:$0 sm:$0xff] }
  0x5f   : > { %2057 = vmatpush3.bf16.msra.mxu1 %v2186_v48 }
  0x60   : > { %2058 = vmatprep.subr.bf16.mxu1 %v2187_v49 }
  0x63   : > { %2059 = vmatpush3.bf16.msra.mxu1 %v2187_v49 }
  0x65   : > { %598 = vmatmul.mubr.bf16.gmra.mrb[4].mxu0 %v1689_v54  ;;  %694 = vmatmul.mubr.bf16.gmra.mrb[4].mxu1 %v1713_v56 }
  0x66   : > { %605 = vmatprep.mubr.bf16.mxu0 %v1692_v55  ;;  %701 = vmatprep.mubr.bf16.mxu1 %v1716_v57 }
  0x6d   : > { %606 = vmatmul.mubr.bf16.gmra.mrb[8].mxu0 %v1691_v58  ;;  %702 = vmatmul.mubr.bf16.gmra.mrb[8].mxu1 %v1715_v60 }
  0x6e   : > { %613 = vmatprep.mubr.bf16.mxu0 %v1694_v59  ;;  %709 = vmatprep.mubr.bf16.mxu1 %v1718_v61 }
  0x75   : > { %614 = vmatmul.mubr.bf16.gmra.mrb[12].mxu0 %v1693_v62  ;;  %710 = vmatmul.mubr.bf16.gmra.mrb[12].mxu1 %v1717_v32 }
  0x76   : > { %621 = vmatprep.mubr.bf16.mxu0 %v1696_v63 }
  0x7d   : > { %622 = vmatmul.mubr.bf16.gmra.mrb[16].mxu0 %v1695_v33 }
  0x7e   : > { %629 = vmatprep.mubr.bf16.mxu0 %v1698_v34 }
  0x85   : > { %630 = vmatmul.mubr.bf16.gmra.mrb[20].mxu0 %v1697_v35 }
  0x86   : > { %637 = vmatprep.mubr.bf16.mxu0 %v1700_v36 }
  0x8d   : > { %638 = vmatmul.mubr.bf16.gmra.mrb[24].mxu0 %v1699_v37 }
  0x8e   : > { %645 = vmatprep.mubr.bf16.mxu0 %v1702_v38 }
  0x95   : > { %646 = vmatmul.mubr.bf16.gmra.mrb[28].mxu0 %v1701_v39 }
  0x96   : > { %653 = vmatprep.mubr.bf16.mxu0 %v1704_v40 }
  0x9d   : > { %654 = vmatmul.mubr.bf16.gmra.mrb[32].mxu0 %v1703_v41 }
  0x9e   : > { %661 = vmatprep.mubr.bf16.mxu0 %v1706_v42 }
  0xa5   : > { %662 = vmatmul.mubr.bf16.gmra.mrb[36].mxu0 %v1705_v43 }
  0xa6   : > { %669 = vmatprep.mubr.bf16.mxu0 %v1708_v44 }
  0xad   : > { %670 = vmatmul.mubr.bf16.gmra.mrb[40].mxu0 %v1707_v45 }
  0xae   : > { %677 = vmatprep.mubr.bf16.mxu0 %v1710_v46 }
  0xb5   : > { %678 = vmatmul.mubr.bf16.gmra.mrb[44].mxu0 %v1709_v47 }
 0x130   : > { %v1830_v50 = vpop.f32.mrb[0].mxu0  ;;  %v1902_v53 = vpop.f32.mrb[0].mxu1 }
 0x131   : > { %v1831_v52 = vpop.f32.mrb[1].mxu0  ;;  %v1903_v56 = vpop.f32.mrb[1].mxu1 }
 0x132   : > { %v1832_v54 = vadd.f32 %v1831_v52, %v1830_v50  ;;  %v1833_v55 = vpop.f32.mrb[2].mxu0  ;;  %v1904_v58 = vadd.f32 %v1903_v56, %v1902_v53  ;;  %v1905_v59 = vpop.f32.mrb[2].mxu1 }
 0x133   : > { %v1834_v57 = vpop.f32.mrb[3].mxu0  ;;  %v1906_v62 = vpop.f32.mrb[3].mxu1 }
 0x134   : > { %v592_v60 = vadd.f32 %v1832_v54, %v2557_v51  ;;  %v1835_v61 = vadd.f32 %v1834_v57, %v1833_v55  ;;  %v688_v63 = vadd.f32 %v1904_v58, %v2557_v51  ;;  %v1907_v32 = vadd.f32 %v1906_v62, %v1905_v59 }
 0x136   : > { %v595_v33 = vadd.f32 %v1835_v61, %v2557_v51  ;;  %v742_v34 = vmax.f32 %v688_v63, 0.0  ;;  %v691_v35 = vadd.f32 %v1907_v32, %v2557_v51  ;;  %v718_v36 = vmax.f32 %v592_v60, 0.0 }
 0x138   : > { %v719_v37 = vmax.f32 %v595_v33, 0.0  ;;  %v1836_v38 = vpop.f32.mrb[4].mxu0  ;;  %v743_v40 = vmax.f32 %v691_v35, 0.0  ;;  %v1908_v41 = vpop.f32.mrb[4].mxu1 }
 0x139   : > { %v1837_v39 = vpop.f32.mrb[5].mxu0  ;;  %v1909_v45 = vpop.f32.mrb[5].mxu1 }
 0x13a   : > { %v750_v42 = vpack.c.bf16 %v719_v37, %v718_v36  ;;  %v1838_v43 = vadd.f32 %v1837_v39, %v1836_v38  ;;  %v1839_v44 = vpop.f32.mrb[6].mxu0  ;;  %v2563_v47 = vpack.c.bf16 %v743_v40, %v742_v34  ;;  %v1910_v48 = vadd.f32 %v1909_v45, %v1908_v41  ;;  %v1911_v49 = vpop.f32.mrb[6].mxu1 }
 0x13b   : > { %v1840_v46 = vpop.f32.mrb[7].mxu0  ;;  %v1912_v53 = vpop.f32.mrb[7].mxu1 }
 0x13c   : > { %v600_v50 = vadd.f32 %v1838_v43, %v2557_v51  ;;  %v1841_v52 = vadd.f32 %v1840_v46, %v1839_v44  ;;  %2060 = vmatprep.mubr.msk.bf16.mxu1 %vm782_vm0, %v750_v42  ;;  %v696_v54 = vadd.f32 %v1910_v48, %v2557_v51  ;;  %v1913_v55 = vadd.f32 %v1912_v53, %v1911_v49 }
 0x13e   : > { %v603_v56 = vadd.f32 %v1841_v52, %v2557_v51  ;;  %v744_v57 = vmax.f32 %v696_v54, 0.0  ;;  %v699_v58 = vadd.f32 %v1913_v55, %v2557_v51  ;;  %v720_v59 = vmax.f32 %v600_v50, 0.0 }
 0x140   : > { %v721_v60 = vmax.f32 %v603_v56, 0.0  ;;  %v1842_v61 = vpop.f32.mrb[8].mxu0  ;;  %v745_v63 = vmax.f32 %v699_v58, 0.0  ;;  %v1914_v32 = vpop.f32.mrb[8].mxu1 }
 0x141   : > { %v1843_v62 = vpop.f32.mrb[9].mxu0  ;;  %v1915_v36 = vpop.f32.mrb[9].mxu1 }
 0x142   : > { %v751_v33 = vpack.c.bf16 %v721_v60, %v720_v59  ;;  %v1844_v34 = vadd.f32 %v1843_v62, %v1842_v61  ;;  %v1845_v35 = vpop.f32.mrb[10].mxu0  ;;  %v2570_v38 = vpack.c.bf16 %v745_v63, %v744_v57  ;;  %v1916_v39 = vadd.f32 %v1915_v36, %v1914_v32  ;;  %v1917_v40 = vpop.f32.mrb[10].mxu1 }
 0x143   : > { %v1846_v37 = vpop.f32.mrb[11].mxu0  ;;  %v1918_v43 = vpop.f32.mrb[11].mxu1 }
 0x144   : > { %v608_v41 = vadd.f32 %v1844_v34, %v2557_v51  ;;  %v1847_v42 = vadd.f32 %v1846_v37, %v1845_v35  ;;  %2061 = vmatmul.mubr.msk.bf16.vlgmr.msra.gmra.mrb[16].mxu1 %vm782_vm0, %v751_v33  ;;  %v704_v44 = vadd.f32 %v1916_v39, %v2557_v51  ;;  %v1919_v45 = vadd.f32 %v1918_v43, %v1917_v40 }
 0x146   : > { %v611_v46 = vadd.f32 %v1847_v42, %v2557_v51  ;;  %v746_v48 = vmax.f32 %v704_v44, 0.0  ;;  %v707_v49 = vadd.f32 %v1919_v45, %v2557_v51  ;;  %v722_v50 = vmax.f32 %v608_v41, 0.0 }
 0x148   : > { %v723_v52 = vmax.f32 %v611_v46, 0.0  ;;  %v1848_v53 = vpop.f32.mrb[12].mxu0  ;;  %v747_v55 = vmax.f32 %v707_v49, 0.0  ;;  %v1920_v56 = vpop.f32.mrb[12].mxu1 }
 0x149   : > { %v1849_v54 = vpop.f32.mrb[13].mxu0  ;;  %v1921_v60 = vpop.f32.mrb[13].mxu1 }
 0x14a   : > { %v752_v57 = vpack.c.bf16 %v723_v52, %v722_v50  ;;  %v1850_v58 = vadd.f32 %v1849_v54, %v1848_v53  ;;  %v1851_v59 = vpop.f32.mrb[14].mxu0  ;;  %v2577_v62 = vpack.c.bf16 %v747_v55, %v746_v48  ;;  %v1922_v63 = vadd.f32 %v1921_v60, %v1920_v56  ;;  %v1923_v32 = vpop.f32.mrb[14].mxu1 }
 0x14b   : > { %v1852_v61 = vpop.f32.mrb[15].mxu0  ;;  %v1924_v35 = vpop.f32.mrb[15].mxu1 }
 0x14c   : > { %v616_v33 = vadd.f32 %v1850_v58, %v2557_v51  ;;  %v1853_v34 = vadd.f32 %v1852_v61, %v1851_v59  ;;  %2064 = vmatprep.mubr.msk.bf16.mxu1 %vm782_vm0, %v752_v57  ;;  %v712_v36 = vadd.f32 %v1922_v63, %v2557_v51  ;;  %v1925_v37 = vadd.f32 %v1924_v35, %v1923_v32 }
 0x14e   : > { %v619_v39 = vadd.f32 %v1853_v34, %v2557_v51  ;;  %v748_v40 = vmax.f32 %v712_v36, 0.0  ;;  %v715_v41 = vadd.f32 %v1925_v37, %v2557_v51  ;;  %v724_v42 = vmax.f32 %v616_v33, 0.0 }
 0x150   : > { %v725_v43 = vmax.f32 %v619_v39, 0.0  ;;  %v1854_v44 = vpop.f32.mrb[16].mxu0  ;;  %v749_v46 = vmax.f32 %v715_v41, 0.0 }
 0x151   : > { %v1855_v45 = vpop.f32.mrb[17].mxu0 }
 0x152   : > { %v753_v48 = vpack.c.bf16 %v725_v43, %v724_v42  ;;  %v1856_v49 = vadd.f32 %v1855_v45, %v1854_v44  ;;  %v1857_v50 = vpop.f32.mrb[18].mxu0  ;;  %v2584_v53 = vpack.c.bf16 %v749_v46, %v748_v40 }
 0x153   : > { %v1858_v52 = vpop.f32.mrb[19].mxu0 }
 0x154   : > { %v624_v54 = vadd.f32 %v1856_v49, %v2557_v51  ;;  %v1859_v55 = vadd.f32 %v1858_v52, %v1857_v50  ;;  %2065 = vmatmul.mubr.msk.bf16.gmra.mrb[20].mxu1 %vm782_vm0, %v753_v48 }
 0x156   : > { %v627_v56 = vadd.f32 %v1859_v55, %v2557_v51  ;;  %v726_v57 = vmax.f32 %v624_v54, 0.0 }
 0x158   : > { %v727_v58 = vmax.f32 %v627_v56, 0.0  ;;  %v1860_v59 = vpop.f32.mrb[20].mxu0 }
 0x159   : > { %v1861_v60 = vpop.f32.mrb[21].mxu0 }
 0x15a   : > { %v754_v61 = vpack.c.bf16 %v727_v58, %v726_v57  ;;  %v1862_v63 = vadd.f32 %v1861_v60, %v1860_v59  ;;  %v1863_v32 = vpop.f32.mrb[22].mxu0 }
 0x15b   : > { %v1864_v33 = vpop.f32.mrb[23].mxu0 }
 0x15c   : > { %v632_v34 = vadd.f32 %v1862_v63, %v2557_v51  ;;  %v1865_v35 = vadd.f32 %v1864_v33, %v1863_v32  ;;  %2068 = vmatprep.mubr.msk.bf16.mxu1 %vm782_vm0, %v754_v61 }
 0x15e   : > { %v635_v36 = vadd.f32 %v1865_v35, %v2557_v51  ;;  %v728_v37 = vmax.f32 %v632_v34, 0.0 }
 0x160   : > { %v729_v39 = vmax.f32 %v635_v36, 0.0  ;;  %v1866_v40 = vpop.f32.mrb[24].mxu0 }
 0x161   : > { %v1867_v41 = vpop.f32.mrb[25].mxu0 }
 0x162   : > { %v755_v42 = vpack.c.bf16 %v729_v39, %v728_v37  ;;  %v1868_v43 = vadd.f32 %v1867_v41, %v1866_v40  ;;  %v1869_v44 = vpop.f32.mrb[26].mxu0 }
 0x163   : > { %v1870_v45 = vpop.f32.mrb[27].mxu0 }
 0x164   : > { %v640_v46 = vadd.f32 %v1868_v43, %v2557_v51  ;;  %v1871_v48 = vadd.f32 %v1870_v45, %v1869_v44  ;;  %2069 = vmatmul.mubr.msk.bf16.gmra.mrb[24].mxu1 %vm782_vm0, %v755_v42 }
 0x166   : > { %v643_v49 = vadd.f32 %v1871_v48, %v2557_v51  ;;  %v730_v50 = vmax.f32 %v640_v46, 0.0 }
 0x168   : > { %v731_v52 = vmax.f32 %v643_v49, 0.0  ;;  %v1872_v54 = vpop.f32.mrb[28].mxu0 }
 0x169   : > { %v1873_v55 = vpop.f32.mrb[29].mxu0 }
 0x16a   : > { %v756_v56 = vpack.c.bf16 %v731_v52, %v730_v50  ;;  %v1874_v57 = vadd.f32 %v1873_v55, %v1872_v54  ;;  %v1875_v58 = vpop.f32.mrb[30].mxu0 }
 0x16b   : > { %v1876_v59 = vpop.f32.mrb[31].mxu0 }
 0x16c   : > { %v648_v60 = vadd.f32 %v1874_v57, %v2557_v51  ;;  %v1877_v61 = vadd.f32 %v1876_v59, %v1875_v58  ;;  %2072 = vmatprep.mubr.msk.bf16.mxu1 %vm782_vm0, %v756_v56 }
 0x16e   : > { %v651_v63 = vadd.f32 %v1877_v61, %v2557_v51  ;;  %v732_v32 = vmax.f32 %v648_v60, 0.0 }
 0x170   : > { %v733_v33 = vmax.f32 %v651_v63, 0.0  ;;  %v1878_v34 = vpop.f32.mrb[32].mxu0 }
 0x171   : > { %v1879_v35 = vpop.f32.mrb[33].mxu0 }
 0x172   : > { %v757_v36 = vpack.c.bf16 %v733_v33, %v732_v32  ;;  %v1880_v37 = vadd.f32 %v1879_v35, %v1878_v34  ;;  %v1881_v39 = vpop.f32.mrb[34].mxu0 }
 0x173   : > { %v1882_v40 = vpop.f32.mrb[35].mxu0 }
 0x174   : > { %v656_v41 = vadd.f32 %v1880_v37, %v2557_v51  ;;  %v1883_v42 = vadd.f32 %v1882_v40, %v1881_v39  ;;  %2073 = vmatmul.mubr.msk.bf16.gmra.mrb[28].mxu1 %vm782_vm0, %v757_v36 }
 0x176   : > { %v659_v43 = vadd.f32 %v1883_v42, %v2557_v51  ;;  %v734_v44 = vmax.f32 %v656_v41, 0.0 }
 0x178   : > { %v735_v45 = vmax.f32 %v659_v43, 0.0  ;;  %v1884_v46 = vpop.f32.mrb[36].mxu0 }
 0x179   : > { %v1885_v48 = vpop.f32.mrb[37].mxu0 }
 0x17a   : > { %v758_v49 = vpack.c.bf16 %v735_v45, %v734_v44  ;;  %v1886_v50 = vadd.f32 %v1885_v48, %v1884_v46  ;;  %v1887_v52 = vpop.f32.mrb[38].mxu0 }
 0x17b   : > { %v1888_v54 = vpop.f32.mrb[39].mxu0 }
 0x17c   : > { %v664_v55 = vadd.f32 %v1886_v50, %v2557_v51  ;;  %v1889_v56 = vadd.f32 %v1888_v54, %v1887_v52  ;;  %2076 = vmatprep.mubr.msk.bf16.mxu1 %vm782_vm0, %v758_v49 }
 0x17e   : > { %v667_v57 = vadd.f32 %v1889_v56, %v2557_v51  ;;  %v736_v58 = vmax.f32 %v664_v55, 0.0 }
 0x180   : > { %v737_v59 = vmax.f32 %v667_v57, 0.0  ;;  %v1890_v60 = vpop.f32.mrb[40].mxu0 }
 0x181   : > { %v1891_v61 = vpop.f32.mrb[41].mxu0 }
 0x182   : > { %v759_v63 = vpack.c.bf16 %v737_v59, %v736_v58  ;;  %v1892_v32 = vadd.f32 %v1891_v61, %v1890_v60  ;;  %v1893_v33 = vpop.f32.mrb[42].mxu0 }
 0x183   : > { %v1894_v34 = vpop.f32.mrb[43].mxu0 }
 0x184   : > { %v672_v35 = vadd.f32 %v1892_v32, %v2557_v51  ;;  %v1895_v36 = vadd.f32 %v1894_v34, %v1893_v33  ;;  %2077 = vmatmul.mubr.msk.bf16.gmra.mrb[32].mxu1 %vm782_vm0, %v759_v63 }
 0x186   : > { %v675_v37 = vadd.f32 %v1895_v36, %v2557_v51  ;;  %v738_v39 = vmax.f32 %v672_v35, 0.0 }
 0x188   : > { %v739_v40 = vmax.f32 %v675_v37, 0.0  ;;  %v1896_v41 = vpop.f32.mrb[44].mxu0 }
 0x189   : > { %v1897_v42 = vpop.f32.mrb[45].mxu0 }
 0x18a   : > { %v760_v43 = vpack.c.bf16 %v739_v40, %v738_v39  ;;  %v1898_v44 = vadd.f32 %v1897_v42, %v1896_v41  ;;  %v1899_v45 = vpop.f32.mrb[46].mxu0 }
 0x18b   : > { %v1900_v46 = vpop.f32.mrb[47].mxu0 }
 0x18c   : > { %v680_v48 = vadd.f32 %v1898_v44, %v2557_v51  ;;  %v1901_v49 = vadd.f32 %v1900_v46, %v1899_v45  ;;  %2080 = vmatprep.mubr.msk.bf16.mxu1 %vm782_vm0, %v760_v43 }
 0x18e   : > { %v683_v50 = vadd.f32 %v1901_v49, %v2557_v51  ;;  %v740_v52 = vmax.f32 %v680_v48, 0.0 }
 0x190   : > { %v741_v54 = vmax.f32 %v683_v50, 0.0 }
 0x192   : > { %v761_v55 = vpack.c.bf16 %v741_v54, %v740_v52 }
 0x194   : > { %2081 = vmatmul.mubr.msk.bf16.gmra.mrb[36].mxu1 %vm782_vm0, %v761_v55 }
 0x195   : > { %2084 = vmatprep.mubr.msk.bf16.mxu1 %vm782_vm0, %v2563_v47 }
 0x19c   : > { %2085 = vmatmul.mubr.msk.bf16.gmra.mrb[40].mxu1 %vm782_vm0, %v2570_v38 }
 0x19d   : > { %2088 = vmatprep.mubr.msk.bf16.mxu1 %vm782_vm0, %v2577_v62 }
 0x1a4   : > { %2089 = vmatmul.mubr.msk.bf16.gmra.mrb[44].mxu1 %vm782_vm0, %v2584_v53 }
 0x217   : > { %v2619_v56 = vpop.f32.mrb[16].mxu1 }
 0x218   : > { %v2621_v51 = vpop.f32.mrb[17].mxu1 }
 0x219   : > { %v2623_v57 = vpop.f32.mrb[18].mxu1 }
 0x21a   : > { %v2625_v58 = vpop.f32.mrb[19].mxu1  ;;  %v997_v31 = vpack.c.bf16 (!%p1753_p4), %v2623_v57, %v2619_v56 }
 0x21b   : > { %v996_v30 = vpack.c.bf16 (!%p1753_p4), %v2625_v58, %v2621_v51 }
 0x227   : > { %v2627_v59 = vpop.f32.mrb[20].mxu1 }
 0x228   : > { %v2629_v47 = vpop.f32.mrb[21].mxu1 }
 0x229   : > { %v2631_v60 = vpop.f32.mrb[22].mxu1 }
 0x22a   : > { %v2633_v38 = vpop.f32.mrb[23].mxu1  ;;  %v999_v15 = vpack.c.bf16 (!%p1753_p4), %v2631_v60, %v2627_v59 }
 0x22b   : > { %v998_v14 = vpack.c.bf16 (!%p1753_p4), %v2633_v38, %v2629_v47 }
 0x237   : > { %v2635_v62 = vpop.f32.mrb[24].mxu1 }
 0x238   : > { %v2637_v61 = vpop.f32.mrb[25].mxu1 }
 0x239   : > { %v2639_v53 = vpop.f32.mrb[26].mxu1 }
 0x23a   : > { %v2641_v63 = vpop.f32.mrb[27].mxu1  ;;  %v1001_v29 = vpack.c.bf16 (!%p1753_p4), %v2639_v53, %v2635_v62 }
 0x23b   : > { %v1000_v28 = vpack.c.bf16 (!%p1753_p4), %v2641_v63, %v2637_v61 }
 0x247   : > { %v2643_v32 = vpop.f32.mrb[28].mxu1 }
 0x248   : > { %v2645_v33 = vpop.f32.mrb[29].mxu1 }
 0x249   : > { %v2647_v34 = vpop.f32.mrb[30].mxu1 }
 0x24a   : > { %v2649_v35 = vpop.f32.mrb[31].mxu1  ;;  %v1003_v13 = vpack.c.bf16 (!%p1753_p4), %v2647_v34, %v2643_v32 }
 0x24b   : > { %v1002_v12 = vpack.c.bf16 (!%p1753_p4), %v2649_v35, %v2645_v33 }
 0x257   : > { %v2651_v36 = vpop.f32.mrb[32].mxu1 }
 0x258   : > { %v2653_v37 = vpop.f32.mrb[33].mxu1 }
 0x259   : > { %v2655_v39 = vpop.f32.mrb[34].mxu1 }
 0x25a   : > { %v2657_v40 = vpop.f32.mrb[35].mxu1  ;;  %v1005_v27 = vpack.c.bf16 (!%p1753_p4), %v2655_v39, %v2651_v36 }
 0x25b   : > { %v1004_v26 = vpack.c.bf16 (!%p1753_p4), %v2657_v40, %v2653_v37 }
 0x267   : > { %v2659_v41 = vpop.f32.mrb[36].mxu1 }
 0x268   : > { %v2661_v42 = vpop.f32.mrb[37].mxu1 }
 0x269   : > { %v2663_v43 = vpop.f32.mrb[38].mxu1 }
 0x26a   : > { %v2665_v44 = vpop.f32.mrb[39].mxu1  ;;  %v1007_v11 = vpack.c.bf16 (!%p1753_p4), %v2663_v43, %v2659_v41 }
 0x26b   : > { %v1006_v10 = vpack.c.bf16 (!%p1753_p4), %v2665_v44, %v2661_v42 }
 0x26f   : > { %v2667_v45 = vpop.f32.mrb[40].mxu1 }
 0x270   : > { %v2669_v46 = vpop.f32.mrb[41].mxu1 }
 0x271   : > { %v2671_v48 = vpop.f32.mrb[42].mxu1 }
 0x272   : > { %v2673_v49 = vpop.f32.mrb[43].mxu1  ;;  %v1009_v25 = vpack.c.bf16 (!%p1753_p4), %v2671_v48, %v2667_v45 }
 0x273   : > { %v1008_v24 = vpack.c.bf16 (!%p1753_p4), %v2673_v49, %v2669_v46 }
 0x274   : > { %995 = sbr.rel (%p1753_p4) target bundleno = 649 (0x289), region = 52 }
 0x277   : > { %v2675_v50 = vpop.f32.mrb[44].mxu1 }
 0x278   : > { %v2677_v52 = vpop.f32.mrb[45].mxu1 }
 0x279   : > { %v2679_v54 = vpop.f32.mrb[46].mxu1 }
 0x27a   : > { %v2681_v55 = vpop.f32.mrb[47].mxu1  ;;  %v1011_v9 = vpack.c.bf16 (!%p1753_p4), %v2679_v54, %v2675_v50 }
 0x27b   : > { %s3096_s16 = smov (!%p1012_p6, %s1016_s16), %s1015_s15  ;;  %v1010_v8 = vpack.c.bf16 %v2681_v55, %v2677_v52 }
 0x27c   : > { %p1756_p8 = scmp.lt.s32.totalorder %s3096_s16, 0  ;;  %s1022_s17 = sadd.s32 2, %s3096_s16 }
 0x27e   : > { %s3098_s17 = smov (!%p1756_p8, %s1022_s17), %s3096_s16 }
 0x27f   : > { %s1811_s23 = sshll.u32 %s3098_s17, 7 }
 0x280   : > { %s1029_s24 = scalar_lea.vmem [#allocation2], %s1811_s23 }
 0x281   : > { %1030 = vst [vmem:[%s1029_s24] sm:$0xff] %v996_v30  ;;  %1031 = vst [vmem:[%s1029_s24 + $0x8] sm:$0xff] %v997_v31 }
 0x282   : > { %1032 = vst [vmem:[%s1029_s24 + $0x10] sm:$0xff] %v998_v14  ;;  %1033 = vst [vmem:[%s1029_s24 + $0x18] sm:$0xff] %v999_v15 }
 0x283   : > { %1034 = vst [vmem:[%s1029_s24 + $0x20] sm:$0xff] %v1000_v28  ;;  %1035 = vst [vmem:[%s1029_s24 + $0x28] sm:$0xff] %v1001_v29 }
 0x284   : > { %1036 = vst [vmem:[%s1029_s24 + $0x30] sm:$0xff] %v1002_v12  ;;  %1037 = vst [vmem:[%s1029_s24 + $0x38] sm:$0xff] %v1003_v13 }
 0x285   : > { %1038 = vst [vmem:[%s1029_s24 + $0x40] sm:$0xff] %v1004_v26  ;;  %1039 = vst [vmem:[%s1029_s24 + $0x48] sm:$0xff] %v1005_v27 }
 0x286   : > { %1040 = vst [vmem:[%s1029_s24 + $0x50] sm:$0xff] %v1006_v10  ;;  %1041 = vst [vmem:[%s1029_s24 + $0x58] sm:$0xff] %v1007_v11 }
 0x287   : > { %1042 = vst [vmem:[%s1029_s24 + $0x60] sm:$0xff] %v1008_v24  ;;  %1043 = vst [vmem:[%s1029_s24 + $0x68] sm:$0xff] %v1009_v25 }
 0x288   : > { %1044 = vst [vmem:[%s1029_s24 + $0x70] sm:$0xff] %v1010_v8  ;;  %1045 = vst [vmem:[%s1029_s24 + $0x78] sm:$0xff] %v1011_v9 }
 0x289 PF: > { %p1759_p10 = scmp.ne.s32.totalorder %s2264_s18, 2 }
 0x28a   : > { %v1760_v14 = vld [vmem:[%s3016_s4] ss:$0 sm:$0xff] (!%p1759_p10) }
 0x28b   : > { %1048 = sbr.rel (%p1759_p10) target bundleno = 669 (0x29d), region = 56  ;;  %v1056_v15 = vadd.f32 (!%p1759_p10), %v1760_v14, %v2621_v51  ;;  %v1057_v12 = vadd.f32 (!%p1759_p10), %v1760_v14, %v2625_v58  ;;  %v1058_v13 = vadd.f32 (!%p1759_p10), %v2619_v56, %v1760_v14  ;;  %v1059_v10 = vadd.f32 (!%p1759_p10), %v2623_v57, %v1760_v14 }
 0x28c   : > { %v1060_v11 = vadd.f32 (!%p1759_p10), %v1760_v14, %v2629_v47  ;;  %v1061_v8 = vadd.f32 (!%p1759_p10), %v1760_v14, %v2633_v38  ;;  %v1062_v9 = vadd.f32 (!%p1759_p10), %v2627_v59, %v1760_v14  ;;  %v1063_v24 = vadd.f32 (!%p1759_p10), %v2631_v60, %v1760_v14 }
 0x28d   : > { %1089 = vst [vmem:[#allocation6] sm:$0xff] (!%p1759_p10), %v1056_v15  ;;  %1090 = vst [vmem:[#allocation6 + $0x8] sm:$0xff] (!%p1759_p10), %v1057_v12  ;;  %v1064_v25 = vadd.f32 (!%p1759_p10), %v1760_v14, %v2637_v61  ;;  %v1065_v26 = vadd.f32 (!%p1759_p10), %v1760_v14, %v2641_v63  ;;  %v1066_v27 = vadd.f32 (!%p1759_p10), %v2635_v62, %v1760_v14 }
 0x28e   : > { %1091 = vst [vmem:[#allocation6 + $0x10] sm:$0xff] (!%p1759_p10), %v1058_v13  ;;  %1092 = vst [vmem:[#allocation6 + $0x18] sm:$0xff] (!%p1759_p10), %v1059_v10  ;;  %v1067_v28 = vadd.f32 (!%p1759_p10), %v2639_v53, %v1760_v14  ;;  %v1068_v29 = vadd.f32 (!%p1759_p10), %v1760_v14, %v2645_v33  ;;  %v1069_v30 = vadd.f32 (!%p1759_p10), %v1760_v14, %v2649_v35 }
 0x28f   : > { %1093 = vst [vmem:[#allocation6 + $0x20] sm:$0xff] (!%p1759_p10), %v1060_v11  ;;  %1094 = vst [vmem:[#allocation6 + $0x28] sm:$0xff] (!%p1759_p10), %v1061_v8  ;;  %v1070_v31 = vadd.f32 (!%p1759_p10), %v2643_v32, %v1760_v14  ;;  %v1071_v56 = vadd.f32 (!%p1759_p10), %v2647_v34, %v1760_v14  ;;  %v1072_v51 = vadd.f32 (!%p1759_p10), %v1760_v14, %v2653_v37 }
 0x290   : > { %1095 = vst [vmem:[#allocation6 + $0x30] sm:$0xff] (!%p1759_p10), %v1062_v9  ;;  %1096 = vst [vmem:[#allocation6 + $0x38] sm:$0xff] (!%p1759_p10), %v1063_v24  ;;  %v1073_v57 = vadd.f32 (!%p1759_p10), %v1760_v14, %v2657_v40  ;;  %v1074_v58 = vadd.f32 (!%p1759_p10), %v2651_v36, %v1760_v14  ;;  %v1075_v59 = vadd.f32 (!%p1759_p10), %v2655_v39, %v1760_v14 }
 0x291   : > { %1097 = vst [vmem:[#allocation6 + $0x40] sm:$0xff] (!%p1759_p10), %v1064_v25  ;;  %1098 = vst [vmem:[#allocation6 + $0x48] sm:$0xff] (!%p1759_p10), %v1065_v26  ;;  %v1076_v47 = vadd.f32 (!%p1759_p10), %v1760_v14, %v2661_v42  ;;  %v1077_v60 = vadd.f32 (!%p1759_p10), %v1760_v14, %v2665_v44  ;;  %v1078_v38 = vadd.f32 (!%p1759_p10), %v2659_v41, %v1760_v14 }
 0x292   : > { %1099 = vst [vmem:[#allocation6 + $0x50] sm:$0xff] %v1066_v27  ;;  %1100 = vst [vmem:[#allocation6 + $0x58] sm:$0xff] %v1067_v28  ;;  %v1079_v62 = vadd.f32 %v2663_v43, %v1760_v14  ;;  %v1080_v61 = vadd.f32 %v1760_v14, %v2669_v46  ;;  %v1081_v53 = vadd.f32 %v1760_v14, %v2673_v49 }
 0x293   : > { %1101 = vst [vmem:[#allocation6 + $0x60] sm:$0xff] %v1068_v29  ;;  %1102 = vst [vmem:[#allocation6 + $0x68] sm:$0xff] %v1069_v30  ;;  %v1082_v63 = vadd.f32 %v2667_v45, %v1760_v14  ;;  %v1083_v32 = vadd.f32 %v2671_v48, %v1760_v14  ;;  %v1084_v33 = vadd.f32 %v1760_v14, %v2677_v52 }
 0x294   : > { %1103 = vst [vmem:[#allocation6 + $0x70] sm:$0xff] %v1070_v31  ;;  %1104 = vst [vmem:[#allocation6 + $0x78] sm:$0xff] %v1071_v56  ;;  %v1085_v34 = vadd.f32 %v1760_v14, %v2681_v55  ;;  %v1086_v35 = vadd.f32 %v2675_v50, %v1760_v14  ;;  %v1087_v36 = vadd.f32 %v2679_v54, %v1760_v14 }
 0x295   : > { %1105 = vst [vmem:[#allocation6 + $0x80] sm:$0xff] %v1072_v51  ;;  %1106 = vst [vmem:[#allocation6 + $0x88] sm:$0xff] %v1073_v57 }
 0x296   : > { %1107 = vst [vmem:[#allocation6 + $0x90] sm:$0xff] %v1074_v58  ;;  %1108 = vst [vmem:[#allocation6 + $0x98] sm:$0xff] %v1075_v59 }
 0x297   : > { %1109 = vst [vmem:[#allocation6 + $0xa0] sm:$0xff] %v1076_v47  ;;  %1110 = vst [vmem:[#allocation6 + $0xa8] sm:$0xff] %v1077_v60 }
 0x298   : > { %1111 = vst [vmem:[#allocation6 + $0xb0] sm:$0xff] %v1078_v38  ;;  %1112 = vst [vmem:[#allocation6 + $0xb8] sm:$0xff] %v1079_v62 }
 0x299   : > { %1113 = vst [vmem:[#allocation6 + $0xc0] sm:$0xff] %v1080_v61  ;;  %1114 = vst [vmem:[#allocation6 + $0xc8] sm:$0xff] %v1081_v53 }
 0x29a   : > { %1115 = vst [vmem:[#allocation6 + $0xd0] sm:$0xff] %v1082_v63  ;;  %1116 = vst [vmem:[#allocation6 + $0xd8] sm:$0xff] %v1083_v32 }
 0x29b   : > { %1117 = vst [vmem:[#allocation6 + $0xe0] sm:$0xff] %v1084_v33  ;;  %1118 = vst [vmem:[#allocation6 + $0xe8] sm:$0xff] %v1085_v34 }
 0x29c   : > { %1119 = vst [vmem:[#allocation6 + $0xf0] sm:$0xff] %v1086_v35  ;;  %1120 = vst [vmem:[#allocation6 + $0xf8] sm:$0xff] %v1087_v36 }
 0x29d PF: > { %p1761_p11 = scmp.le.s32.totalorder %s2264_s18, 0 }
 0x29e   : > { %s1125_s27 = sadd.s32 (!%p1761_p11), 1, %s2264_s18  ;;  %v1768_v37 = vcombine.high (!%p1761_p11), %v2371_v0, %v2373_v1  ;;  %v1784_v39 = vcombine.high (!%p1761_p11), %v2403_v16, %v2405_v17  ;;  %v1767_v13 = vcombine.low (!%p1761_p11), %v2371_v0, %v2373_v1  ;;  %v1783_v10 = vcombine.low (!%p1761_p11), %v2403_v16, %v2405_v17  ;;  %v3082_v51 = vld [vmem:[#allocation14_spill] sm:$0xff] (!%p1761_p11)  ;;  %v3083_v57 = vld [vmem:[#allocation13_spill] sm:$0xff] (!%p1761_p11)  ;;  %v3086_v61 = vld [vmem:[#allocation16_spill] sm:$0xff] (!%p1761_p11)  ;;  %p1799_p0 = scmp.eq.s32.totalorder (!%p1761_p11), %s2264_s18, 2 }
 0x29f   : > { %1124 = sbr.rel (%p1761_p11) target bundleno = 1023 (0x3ff), region = 60  ;;  %p1126_p12 = scmp.lt.s32.totalorder (!%p1761_p11), %s1125_s27, 0  ;;  %v1770_v11 = vcombine.high (!%p1761_p11), %v2375_v2, %v2377_v3  ;;  %v1786_v8 = vcombine.high (!%p1761_p11), %v2407_v18, %v2409_v19  ;;  %v1769_v9 = vcombine.low (!%p1761_p11), %v2375_v2, %v2377_v3  ;;  %v1785_v0 = vcombine.low (!%p1761_p11), %v2407_v18, %v2409_v19  ;;  %v3087_v53 = vld [vmem:[#allocation15_spill] sm:$0xff] (!%p1761_p11) }
 0x2a0   : > { %s1127_s28 = ssub.s32 (!%p1761_p11), 0, %s1125_s27  ;;  %1349 = vmatprep.mubr.bf16.mxu0 (!%p1761_p11), %v1768_v37  ;;  %1413 = vmatprep.mubr.bf16.mxu1 (!%p1761_p11), %v1784_v39  ;;  %v1772_v1 = vcombine.high (!%p1761_p11), %v2379_v4, %v2381_v5  ;;  %v1788_v16 = vcombine.high (!%p1761_p11), %v2411_v20, %v2413_v21  ;;  %v1771_v17 = vcombine.low (!%p1761_p11), %v2379_v4, %v2381_v5  ;;  %v3074_v4 = vld [vmem:[#allocation10_spill] sm:$0xff] (!%p1761_p11)  ;;  %v3075_v5 = vld [vmem:[#allocation9_spill] sm:$0xff] (!%p1761_p11) }
 0x2a1   : > { %s1762_s29 = smin.u32 (!%p1761_p11), %s1127_s28, %s1125_s27  ;;  %v1787_v24 = vcombine.low (!%p1761_p11), %v2411_v20, %v2413_v21  ;;  %v1774_v2 = vcombine.high (!%p1761_p11), %v2383_v6, %v2385_v7  ;;  %v1790_v3 = vcombine.high (!%p1761_p11), %v2415_v22, %v2417_v23  ;;  %v1773_v18 = vcombine.low (!%p1761_p11), %v2383_v6, %v2385_v7  ;;  %v3076_v20 = vld [vmem:[#allocation18_spill] sm:$0xff] (!%p1761_p11)  ;;  %v3077_v21 = vld [vmem:[#allocation17_spill] sm:$0xff] (!%p1761_p11)  ;;  %v3078_v6 = vld [vmem:[#allocation12_spill] sm:$0xff] (!%p1761_p11) }
 0x2a2   : > { %s1129_s30 = sand.u32 (!%p1761_p11), 1, %s1762_s29   ;;  %v1789_v19 = vcombine.low (!%p1761_p11), %v2415_v22, %v2417_v23  ;;  %v1776_v25 = vcombine.high (!%p1761_p11), %v3075_v5, %v3074_v4  ;;  %v1792_v26 = vcombine.high (!%p1761_p11), %v3077_v21, %v3076_v20  ;;  %v1775_v27 = vcombine.low (!%p1761_p11), %v3075_v5, %v3074_v4  ;;  %v3079_v7 = vld [vmem:[#allocation11_spill] sm:$0xff] (!%p1761_p11)  ;;  %v3080_v22 = vld [vmem:[#allocation20_spill] sm:$0xff] (!%p1761_p11)  ;;  %v3084_v59 = vld [vmem:[#allocation22_spill] sm:$0xff] (!%p1761_p11) }
 0x2a3   : > { %s1130_s6 = ssub.s32 (!%p1761_p11), 0, %s1129_s30  ;;  %v1791_v28 = vcombine.low (!%p1761_p11), %v3077_v21, %v3076_v20  ;;  %v1778_v29 = vcombine.high (!%p1761_p11), %v3079_v7, %v3078_v6  ;;  %v3081_v23 = vld [vmem:[#allocation19_spill] sm:$0xff] (!%p1761_p11)  ;;  %v1777_v31 = vcombine.low (!%p1761_p11), %v3079_v7, %v3078_v6  ;;  %v1780_v58 = vcombine.high (!%p1761_p11), %v3083_v57, %v3082_v51  ;;  %v3085_v47 = vld [vmem:[#allocation21_spill] sm:$0xff] (!%p1761_p11)  ;;  %v3088_v32 = vld [vmem:[#allocation24_spill] sm:$0xff] (!%p1761_p11) }
 0x2a4   : > { %v1794_v30 = vcombine.high (!%p1761_p11), %v3081_v23, %v3080_v22  ;;  %v1793_v56 = vcombine.low (!%p1761_p11), %v3081_v23, %v3080_v22  ;;  %v1796_v60 = vcombine.high (!%p1761_p11), %v3085_v47, %v3084_v59  ;;  %v1779_v38 = vcombine.low (!%p1761_p11), %v3083_v57, %v3082_v51  ;;  %v3089_v33 = vld [vmem:[#allocation23_spill] sm:$0xff] (!%p1761_p11) }
 0x2a5   : > { %v1795_v62 = vcombine.low (!%p1761_p11), %v3085_v47, %v3084_v59  ;;  %v1782_v63 = vcombine.high (!%p1761_p11), %v3087_v53, %v3086_v61  ;;  %v1798_v34 = vcombine.high (!%p1761_p11), %v3089_v33, %v3088_v32  ;;  %v1781_v35 = vcombine.low (!%p1761_p11), %v3087_v53, %v3086_v61 }
 0x2a6   : > { %s3100_s6 = smov (!%p1126_p12, %s1130_s6), %s1129_s30  ;;  %v1797_v36 = vcombine.low %v3089_v33, %v3088_v32  ;;  %p1498_p1 = scmp.lt.s32.totalorder (!%p1799_p0), %s2264_s18, 0 }
 0x2a7   : > { %p1764_p13 = scmp.lt.s32.totalorder %s3100_s6, 0  ;;  %s1136_s7 = sadd.s32 2, %s3100_s6 }
 0x2a8   : > { %s1499_s10 = ssub.s32 (!%p1799_p0), 0, %s2264_s18 }
 0x2a9   : > { %s3102_s7 = smov (!%p1764_p13, %s1136_s7), %s3100_s6  ;;  %s1800_s11 = smin.u32 (!%p1799_p0), %s2264_s18, %s1499_s10 }
 0x2aa   : > { %s1812_s8 = sshll.u32 %s3102_s7, 7  ;;  %s1501_s12 = sand.u32 (!%p1799_p0), 1, %s1800_s11  }
 0x2ab   : > { %s2761_s9 = scalar_lea.vmem [#allocation2], %s1812_s8  ;;  %s1502_s13 = ssub.s32 (!%p1799_p0), 0, %s1501_s12 }
 0x2ac   : > { %v1149_v40 = vld [vmem:[%s2761_s9 + $0x40] sm:$0xff]  ;;  %v1150_v42 = vld [vmem:[%s2761_s9 + $0x48] sm:$0xff]  ;;  %v1151_v44 = vld [vmem:[%s2761_s9 + $0x50] sm:$0xff] }
 0x2ad   : > { %v1141_v41 = vld [vmem:[%s2761_s9] sm:$0xff]  ;;  %1944 = vmatprep.subr.bf16.mxu0 %v1149_v40  ;;  %2108 = vmatprep.subr.bf16.mxu1 %v1149_v40  ;;  %v1142_v43 = vld [vmem:[%s2761_s9 + $0x8] sm:$0xff]  ;;  %v1143_v45 = vld [vmem:[%s2761_s9 + $0x10] sm:$0xff] }
 0x2ae   : > { %1945 = vmatpush3.bf16.msra.mxu0 %v1141_v41  ;;  %2116 = vmatpush3.bf16.msra.mxu1 %v1141_v41  ;;  %v1152_v46 = vld [vmem:[%s2761_s9 + $0x58] sm:$0xff]  ;;  %v1153_v49 = vld [vmem:[%s2761_s9 + $0x60] sm:$0xff]  ;;  %v1154_v52 = vld [vmem:[%s2761_s9 + $0x68] sm:$0xff] }
 0x2af   : > { %1946 = vmatprep.subr.bf16.mxu0 %v1150_v42  ;;  %2109 = vmatprep.subr.bf16.mxu1 %v1150_v42  ;;  %v1144_v48 = vld [vmem:[%s2761_s9 + $0x18] sm:$0xff]  ;;  %v1145_v50 = vld [vmem:[%s2761_s9 + $0x20] sm:$0xff]  ;;  %v1146_v54 = vld [vmem:[%s2761_s9 + $0x28] sm:$0xff] }
 0x2b0   : > { %v1155_v55 = vld [vmem:[%s2761_s9 + $0x70] sm:$0xff]  ;;  %v1156_v15 = vld [vmem:[%s2761_s9 + $0x78] sm:$0xff] }
 0x2b1   : > { %v1147_v14 = vld [vmem:[%s2761_s9 + $0x30] sm:$0xff]  ;;  %v1148_v12 = vld [vmem:[%s2761_s9 + $0x38] sm:$0xff] }
 0x2b2   : > { %1947 = vmatpush3.bf16.msra.mxu0 %v1142_v43  ;;  %2117 = vmatpush3.bf16.msra.mxu1 %v1142_v43 }
 0x2b3   : > { %1948 = vmatprep.subr.bf16.mxu0 %v1151_v44  ;;  %2110 = vmatprep.subr.bf16.mxu1 %v1151_v44 }
 0x2b6   : > { %1949 = vmatpush3.bf16.msra.mxu0 %v1143_v45  ;;  %2118 = vmatpush3.bf16.msra.mxu1 %v1143_v45 }
 0x2b7   : > { %1950 = vmatprep.subr.bf16.mxu0 %v1152_v46  ;;  %2111 = vmatprep.subr.bf16.mxu1 %v1152_v46 }
 0x2ba   : > { %1951 = vmatpush3.bf16.msra.mxu0 %v1144_v48  ;;  %2119 = vmatpush3.bf16.msra.mxu1 %v1144_v48 }
 0x2bb   : > { %1952 = vmatprep.subr.bf16.mxu0 %v1153_v49  ;;  %2112 = vmatprep.subr.bf16.mxu1 %v1153_v49 }
 0x2be   : > { %1953 = vmatpush3.bf16.msra.mxu0 %v1145_v50  ;;  %2120 = vmatpush3.bf16.msra.mxu1 %v1145_v50 }
 0x2bf   : > { %1954 = vmatprep.subr.bf16.mxu0 %v1154_v52  ;;  %2113 = vmatprep.subr.bf16.mxu1 %v1154_v52 }
 0x2c2   : > { %1955 = vmatpush3.bf16.msra.mxu0 %v1146_v54  ;;  %2121 = vmatpush3.bf16.msra.mxu1 %v1146_v54 }
 0x2c3   : > { %1956 = vmatprep.subr.bf16.mxu0 %v1155_v55  ;;  %2114 = vmatprep.subr.bf16.mxu1 %v1155_v55 }
 0x2c6   : > { %1957 = vmatpush3.bf16.msra.mxu0 %v1147_v14  ;;  %2122 = vmatpush3.bf16.msra.mxu1 %v1147_v14 }
 0x2c7   : > { %1958 = vmatprep.subr.bf16.mxu0 %v1156_v15  ;;  %2115 = vmatprep.subr.bf16.mxu1 %v1156_v15 }
 0x2ca   : > { %1959 = vmatpush3.bf16.msra.mxu0 %v1148_v12  ;;  %2123 = vmatpush3.bf16.msra.mxu1 %v1148_v12 }
 0x2cd   : > { %1350 = vmatmul.mubr.bf16.vlgmr.msra.gmra.mrb[0].mxu0 %v1767_v13  ;;  %1414 = vmatmul.mubr.bf16.vlgmr.msra.gmra.mrb[0].mxu1 %v1783_v10 }
 0x2ce   : > { %1357 = vmatprep.mubr.bf16.mxu0 %v1770_v11  ;;  %1421 = vmatprep.mubr.bf16.mxu1 %v1786_v8 }
 0x2d5   : > { %1358 = vmatmul.mubr.bf16.gmra.mrb[4].mxu0 %v1769_v9  ;;  %1422 = vmatmul.mubr.bf16.gmra.mrb[4].mxu1 %v1785_v0 }
 0x2d6   : > { %1365 = vmatprep.mubr.bf16.mxu0 %v1772_v1  ;;  %1429 = vmatprep.mubr.bf16.mxu1 %v1788_v16 }
 0x2dd   : > { %1366 = vmatmul.mubr.bf16.gmra.mrb[8].mxu0 %v1771_v17  ;;  %1430 = vmatmul.mubr.bf16.gmra.mrb[8].mxu1 %v1787_v24 }
 0x2de   : > { %1373 = vmatprep.mubr.bf16.mxu0 %v1774_v2  ;;  %1437 = vmatprep.mubr.bf16.mxu1 %v1790_v3 }
 0x2e5   : > { %1374 = vmatmul.mubr.bf16.gmra.mrb[12].mxu0 %v1773_v18  ;;  %1438 = vmatmul.mubr.bf16.gmra.mrb[12].mxu1 %v1789_v19 }
 0x2e6   : > { %1381 = vmatprep.mubr.bf16.mxu0 %v1776_v25  ;;  %1445 = vmatprep.mubr.bf16.mxu1 %v1792_v26 }
 0x2ed   : > { %1382 = vmatmul.mubr.bf16.gmra.mrb[16].mxu0 %v1775_v27  ;;  %1446 = vmatmul.mubr.bf16.gmra.mrb[16].mxu1 %v1791_v28 }
 0x2ee   : > { %1389 = vmatprep.mubr.bf16.mxu0 %v1778_v29  ;;  %1453 = vmatprep.mubr.bf16.mxu1 %v1794_v30 }
 0x2f5   : > { %1390 = vmatmul.mubr.bf16.gmra.mrb[20].mxu0 %v1777_v31  ;;  %1454 = vmatmul.mubr.bf16.gmra.mrb[20].mxu1 %v1793_v56 }
 0x2f6   : > { %1397 = vmatprep.mubr.bf16.mxu0 %v1780_v58  ;;  %1461 = vmatprep.mubr.bf16.mxu1 %v1796_v60 }
 0x2fd   : > { %1398 = vmatmul.mubr.bf16.gmra.mrb[24].mxu0 %v1779_v38  ;;  %1462 = vmatmul.mubr.bf16.gmra.mrb[24].mxu1 %v1795_v62 }
 0x2fe   : > { %1405 = vmatprep.mubr.bf16.mxu0 %v1782_v63  ;;  %1469 = vmatprep.mubr.bf16.mxu1 %v1798_v34 }
 0x305   : > { %1406 = vmatmul.mubr.bf16.gmra.mrb[28].mxu0 %v1781_v35  ;;  %1470 = vmatmul.mubr.bf16.gmra.mrb[28].mxu1 %v1797_v36 }
 0x3a0   : > { %v1960_v37 = vpop.f32.mrb[0].mxu0  ;;  %v2008_v39 = vpop.f32.mrb[0].mxu1 }
 0x3a1   : > { %v1961_v40 = vpop.f32.mrb[1].mxu0  ;;  %v2009_v41 = vpop.f32.mrb[1].mxu1 }
 0x3a2   : > { %v2839_v42 = vadd.f32 %v1961_v40, %v1960_v37  ;;  %v2841_v43 = vadd.f32 %v2009_v41, %v2008_v39  ;;  %v1963_v44 = vpop.f32.mrb[2].mxu0  ;;  %v2011_v45 = vpop.f32.mrb[2].mxu1 }
 0x3a3   : > { %v1964_v46 = vpop.f32.mrb[3].mxu0  ;;  %v2012_v48 = vpop.f32.mrb[3].mxu1 }
 0x3a4   : > { %v2843_v49 = vadd.f32 %v1964_v46, %v1963_v44  ;;  %v2845_v50 = vadd.f32 %v2012_v48, %v2011_v45 }
 0x3a8   : > { %v1966_v52 = vpop.f32.mrb[4].mxu0  ;;  %v2014_v54 = vpop.f32.mrb[4].mxu1 }
 0x3a9   : > { %v1967_v55 = vpop.f32.mrb[5].mxu0  ;;  %v2015_v14 = vpop.f32.mrb[5].mxu1 }
 0x3aa   : > { %v2847_v15 = vadd.f32 %v1967_v55, %v1966_v52  ;;  %v2849_v12 = vadd.f32 %v2015_v14, %v2014_v54  ;;  %v1969_v13 = vpop.f32.mrb[6].mxu0  ;;  %v2017_v10 = vpop.f32.mrb[6].mxu1 }
 0x3ab   : > { %v1970_v11 = vpop.f32.mrb[7].mxu0  ;;  %v2018_v8 = vpop.f32.mrb[7].mxu1 }
 0x3ac   : > { %v2851_v9 = vadd.f32 %v1970_v11, %v1969_v13  ;;  %v2853_v0 = vadd.f32 %v2018_v8, %v2017_v10 }
 0x3b0   : > { %v1972_v1 = vpop.f32.mrb[8].mxu0  ;;  %v2020_v16 = vpop.f32.mrb[8].mxu1 }
 0x3b1   : > { %v1973_v17 = vpop.f32.mrb[9].mxu0  ;;  %v2021_v24 = vpop.f32.mrb[9].mxu1 }
 0x3b2   : > { %v2855_v2 = vadd.f32 %v1973_v17, %v1972_v1  ;;  %v2857_v3 = vadd.f32 %v2021_v24, %v2020_v16  ;;  %v1975_v18 = vpop.f32.mrb[10].mxu0  ;;  %v2023_v19 = vpop.f32.mrb[10].mxu1 }
 0x3b3   : > { %v1976_v4 = vpop.f32.mrb[11].mxu0  ;;  %v2024_v5 = vpop.f32.mrb[11].mxu1 }
 0x3b4   : > { %v2859_v25 = vadd.f32 %v1976_v4, %v1975_v18  ;;  %v2861_v20 = vadd.f32 %v2024_v5, %v2023_v19 }
 0x3b8   : > { %v1978_v21 = vpop.f32.mrb[12].mxu0  ;;  %v2026_v26 = vpop.f32.mrb[12].mxu1 }
 0x3b9   : > { %v1979_v27 = vpop.f32.mrb[13].mxu0  ;;  %v2027_v28 = vpop.f32.mrb[13].mxu1 }
 0x3ba   : > { %v2863_v6 = vadd.f32 %v1979_v27, %v1978_v21  ;;  %v2865_v7 = vadd.f32 %v2027_v28, %v2026_v26  ;;  %v1981_v29 = vpop.f32.mrb[14].mxu0  ;;  %v2029_v22 = vpop.f32.mrb[14].mxu1 }
 0x3bb   : > { %v1982_v23 = vpop.f32.mrb[15].mxu0  ;;  %v2030_v30 = vpop.f32.mrb[15].mxu1 }
 0x3bc   : > { %v2867_v31 = vadd.f32 %v1982_v23, %v1981_v29  ;;  %v2869_v56 = vadd.f32 %v2030_v30, %v2029_v22 }
 0x3c0   : > { %v1984_v51 = vpop.f32.mrb[16].mxu0  ;;  %v2032_v57 = vpop.f32.mrb[16].mxu1 }
 0x3c1   : > { %v1985_v58 = vpop.f32.mrb[17].mxu0  ;;  %v2033_v59 = vpop.f32.mrb[17].mxu1 }
 0x3c2   : > { %v2871_v47 = vadd.f32 %v1985_v58, %v1984_v51  ;;  %v2873_v60 = vadd.f32 %v2033_v59, %v2032_v57  ;;  %v1987_v38 = vpop.f32.mrb[18].mxu0  ;;  %v2035_v62 = vpop.f32.mrb[18].mxu1  ;;  %v1482_v51 = vpack.c.bf16 (!%p1799_p0), %v2843_v49, %v2839_v42  ;;  %v1483_v57 = vpack.c.bf16 (!%p1799_p0), %v2851_v9, %v2847_v15 }
 0x3c3   : > { %v1988_v61 = vpop.f32.mrb[19].mxu0  ;;  %v2036_v53 = vpop.f32.mrb[19].mxu1  ;;  %v1484_v58 = vpack.c.bf16 (!%p1799_p0), %v2859_v25, %v2855_v2  ;;  %v1485_v59 = vpack.c.bf16 (!%p1799_p0), %v2867_v31, %v2863_v6 }
 0x3c4   : > { %v2875_v63 = vadd.f32 %v1988_v61, %v1987_v38  ;;  %v2877_v32 = vadd.f32 %v2036_v53, %v2035_v62 }
 0x3c6   : > { %v1486_v38 = vpack.c.bf16 (!%p1799_p0), %v2875_v63, %v2871_v47 }
 0x3c8   : > { %v1990_v33 = vpop.f32.mrb[20].mxu0  ;;  %v2038_v34 = vpop.f32.mrb[20].mxu1 }
 0x3c9   : > { %v1991_v35 = vpop.f32.mrb[21].mxu0  ;;  %v2039_v36 = vpop.f32.mrb[21].mxu1 }
 0x3ca   : > { %v2879_v37 = vadd.f32 %v1991_v35, %v1990_v33  ;;  %v2881_v39 = vadd.f32 %v2039_v36, %v2038_v34  ;;  %v1993_v40 = vpop.f32.mrb[22].mxu0  ;;  %v2041_v41 = vpop.f32.mrb[22].mxu1  ;;  %v1490_v33 = vpack.c.bf16 (!%p1799_p0), %v2845_v50, %v2841_v43  ;;  %v1491_v34 = vpack.c.bf16 (!%p1799_p0), %v2853_v0, %v2849_v12 }
 0x3cb   : > { %v1994_v44 = vpop.f32.mrb[23].mxu0  ;;  %v2042_v45 = vpop.f32.mrb[23].mxu1  ;;  %v1492_v35 = vpack.c.bf16 (!%p1799_p0), %v2861_v20, %v2857_v3  ;;  %v1493_v36 = vpack.c.bf16 (!%p1799_p0), %v2869_v56, %v2865_v7 }
 0x3cc   : > { %v2883_v46 = vadd.f32 %v1994_v44, %v1993_v40  ;;  %v2885_v48 = vadd.f32 %v2042_v45, %v2041_v41  ;;  %v1494_v40 = vpack.c.bf16 (!%p1799_p0), %v2877_v32, %v2873_v60 }
 0x3ce   : > { %v1487_v62 = vpack.c.bf16 (!%p1799_p0), %v2883_v46, %v2879_v37  ;;  %v1495_v41 = vpack.c.bf16 (!%p1799_p0), %v2885_v48, %v2881_v39 }
 0x3d0   : > { %v1996_v52 = vpop.f32.mrb[24].mxu0  ;;  %v2044_v54 = vpop.f32.mrb[24].mxu1 }
 0x3d1   : > { %v1997_v55 = vpop.f32.mrb[25].mxu0  ;;  %v2045_v14 = vpop.f32.mrb[25].mxu1 }
 0x3d2   : > { %v2887_v13 = vadd.f32 %v1997_v55, %v1996_v52  ;;  %v2889_v10 = vadd.f32 %v2045_v14, %v2044_v54  ;;  %v1999_v11 = vpop.f32.mrb[26].mxu0  ;;  %v2047_v8 = vpop.f32.mrb[26].mxu1 }
 0x3d3   : > { %v2000_v1 = vpop.f32.mrb[27].mxu0  ;;  %v2048_v16 = vpop.f32.mrb[27].mxu1 }
 0x3d4   : > { %v2891_v17 = vadd.f32 %v2000_v1, %v1999_v11  ;;  %v2893_v24 = vadd.f32 %v2048_v16, %v2047_v8 }
 0x3d6   : > { %1481 = sbr.rel (%p1799_p0) target bundleno = 1003 (0x3eb), region = 64  ;;  %v1488_v61 = vpack.c.bf16 (!%p1799_p0), %v2891_v17, %v2887_v13  ;;  %v1496_v44 = vpack.c.bf16 (!%p1799_p0), %v2893_v24, %v2889_v10 }
 0x3d8   : > { %v2002_v18 = vpop.f32.mrb[28].mxu0  ;;  %v2050_v19 = vpop.f32.mrb[28].mxu1 }
 0x3d9   : > { %v2003_v4 = vpop.f32.mrb[29].mxu0  ;;  %v2051_v5 = vpop.f32.mrb[29].mxu1 }
 0x3da   : > { %v2895_v21 = vadd.f32 %v2003_v4, %v2002_v18  ;;  %v2897_v26 = vadd.f32 %v2051_v5, %v2050_v19  ;;  %v2005_v27 = vpop.f32.mrb[30].mxu0  ;;  %v2053_v28 = vpop.f32.mrb[30].mxu1 }
 0x3db   : > { %v2006_v29 = vpop.f32.mrb[31].mxu0  ;;  %v2054_v22 = vpop.f32.mrb[31].mxu1 }
 0x3dc   : > { %v2899_v23 = vadd.f32 %v2006_v29, %v2005_v27  ;;  %v2901_v30 = vadd.f32 %v2054_v22, %v2053_v28 }
 0x3dd   : > { %s3104_s13 = smov (!%p1498_p1, %s1502_s13), %s1501_s12 }
 0x3de   : > { %p1802_p2 = scmp.lt.s32.totalorder %s3104_s13, 0  ;;  %s1508_s14 = sadd.s32 2, %s3104_s13  ;;  %v1489_v53 = vpack.c.bf16 %v2899_v23, %v2895_v21  ;;  %v1497_v45 = vpack.c.bf16 %v2901_v30, %v2897_v26 }
 0x3e0   : > { %s3106_s14 = smov (!%p1802_p2, %s1508_s14), %s3104_s13 }
 0x3e1   : > { %s1813_s15 = sshll.u32 %s3106_s14, 7 }
 0x3e2   : > { %s1515_s16 = scalar_lea.vmem [#allocation2], %s1813_s15 }
 0x3e3   : > { %1516 = vst [vmem:[%s1515_s16] sm:$0xff] %v1482_v51  ;;  %1517 = vst [vmem:[%s1515_s16 + $0x8] sm:$0xff] %v1483_v57 }
 0x3e4   : > { %1518 = vst [vmem:[%s1515_s16 + $0x10] sm:$0xff] %v1484_v58  ;;  %1519 = vst [vmem:[%s1515_s16 + $0x18] sm:$0xff] %v1485_v59 }
 0x3e5   : > { %1520 = vst [vmem:[%s1515_s16 + $0x20] sm:$0xff] %v1486_v38  ;;  %1521 = vst [vmem:[%s1515_s16 + $0x28] sm:$0xff] %v1487_v62 }
 0x3e6   : > { %1522 = vst [vmem:[%s1515_s16 + $0x30] sm:$0xff] %v1488_v61  ;;  %1523 = vst [vmem:[%s1515_s16 + $0x38] sm:$0xff] %v1489_v53 }
 0x3e7   : > { %1524 = vst [vmem:[%s1515_s16 + $0x40] sm:$0xff] %v1490_v33  ;;  %1525 = vst [vmem:[%s1515_s16 + $0x48] sm:$0xff] %v1491_v34 }
 0x3e8   : > { %1526 = vst [vmem:[%s1515_s16 + $0x50] sm:$0xff] %v1492_v35  ;;  %1527 = vst [vmem:[%s1515_s16 + $0x58] sm:$0xff] %v1493_v36 }
 0x3e9   : > { %1528 = vst [vmem:[%s1515_s16 + $0x60] sm:$0xff] %v1494_v40  ;;  %1529 = vst [vmem:[%s1515_s16 + $0x68] sm:$0xff] %v1495_v41 }
 0x3ea   : > { %1530 = vst [vmem:[%s1515_s16 + $0x70] sm:$0xff] %v1496_v44  ;;  %1531 = vst [vmem:[%s1515_s16 + $0x78] sm:$0xff] %v1497_v45 }
 0x3eb PF: > { %p1805_p5 = scmp.ne.s32.totalorder %s2264_s18, 2 }
 0x3ec   : > { %v1806_v52 = vld [vmem:[%s3016_s4] ss:$0 sm:$0xff] (!%p1805_p5) }
 0x3ed   : > { %1534 = sbr.rel (%p1805_p5) target bundleno = 1023 (0x3ff), region = 68  ;;  %v1542_v54 = vadd.f32 (!%p1805_p5), %v2839_v42, %v1806_v52  ;;  %v1543_v55 = vadd.f32 (!%p1805_p5), %v2843_v49, %v1806_v52  ;;  %v1544_v14 = vadd.f32 (!%p1805_p5), %v2847_v15, %v1806_v52  ;;  %v1545_v11 = vadd.f32 (!%p1805_p5), %v2851_v9, %v1806_v52 }
 0x3ee   : > { %v1546_v8 = vadd.f32 (!%p1805_p5), %v2855_v2, %v1806_v52  ;;  %v1547_v1 = vadd.f32 (!%p1805_p5), %v2859_v25, %v1806_v52  ;;  %v1548_v16 = vadd.f32 (!%p1805_p5), %v2863_v6, %v1806_v52  ;;  %v1549_v18 = vadd.f32 (!%p1805_p5), %v2867_v31, %v1806_v52 }
 0x3ef   : > { %1575 = vst [vmem:[#allocation6] sm:$0xff] (!%p1805_p5), %v1542_v54  ;;  %1576 = vst [vmem:[#allocation6 + $0x8] sm:$0xff] (!%p1805_p5), %v1543_v55  ;;  %v1550_v42 = vadd.f32 (!%p1805_p5), %v2871_v47, %v1806_v52  ;;  %v1551_v49 = vadd.f32 (!%p1805_p5), %v2875_v63, %v1806_v52  ;;  %v1552_v15 = vadd.f32 (!%p1805_p5), %v2879_v37, %v1806_v52 }
 0x3f0   : > { %1577 = vst [vmem:[#allocation6 + $0x10] sm:$0xff] (!%p1805_p5), %v1544_v14  ;;  %1578 = vst [vmem:[#allocation6 + $0x18] sm:$0xff] (!%p1805_p5), %v1545_v11  ;;  %v1553_v9 = vadd.f32 (!%p1805_p5), %v2883_v46, %v1806_v52  ;;  %v1554_v2 = vadd.f32 (!%p1805_p5), %v2887_v13, %v1806_v52  ;;  %v1555_v25 = vadd.f32 (!%p1805_p5), %v2891_v17, %v1806_v52 }
 0x3f1   : > { %1579 = vst [vmem:[#allocation6 + $0x20] sm:$0xff] (!%p1805_p5), %v1546_v8  ;;  %1580 = vst [vmem:[#allocation6 + $0x28] sm:$0xff] (!%p1805_p5), %v1547_v1  ;;  %v1556_v6 = vadd.f32 (!%p1805_p5), %v2895_v21, %v1806_v52  ;;  %v1557_v31 = vadd.f32 (!%p1805_p5), %v2899_v23, %v1806_v52  ;;  %v1558_v47 = vadd.f32 (!%p1805_p5), %v2841_v43, %v1806_v52 }
 0x3f2   : > { %1581 = vst [vmem:[#allocation6 + $0x30] sm:$0xff] (!%p1805_p5), %v1548_v16  ;;  %1582 = vst [vmem:[#allocation6 + $0x38] sm:$0xff] (!%p1805_p5), %v1549_v18  ;;  %v1559_v63 = vadd.f32 (!%p1805_p5), %v2845_v50, %v1806_v52  ;;  %v1560_v37 = vadd.f32 (!%p1805_p5), %v2849_v12, %v1806_v52  ;;  %v1561_v46 = vadd.f32 (!%p1805_p5), %v2853_v0, %v1806_v52 }
 0x3f3   : > { %1583 = vst [vmem:[#allocation6 + $0x40] sm:$0xff] (!%p1805_p5), %v1550_v42  ;;  %1584 = vst [vmem:[#allocation6 + $0x48] sm:$0xff] (!%p1805_p5), %v1551_v49  ;;  %v1562_v13 = vadd.f32 (!%p1805_p5), %v2857_v3, %v1806_v52  ;;  %v1563_v17 = vadd.f32 (!%p1805_p5), %v2861_v20, %v1806_v52  ;;  %v1564_v19 = vadd.f32 (!%p1805_p5), %v2865_v7, %v1806_v52 }
 0x3f4   : > { %1585 = vst [vmem:[#allocation6 + $0x50] sm:$0xff] %v1552_v15  ;;  %1586 = vst [vmem:[#allocation6 + $0x58] sm:$0xff] %v1553_v9  ;;  %v1565_v4 = vadd.f32 %v2869_v56, %v1806_v52  ;;  %v1566_v43 = vadd.f32 %v2873_v60, %v1806_v52  ;;  %v1567_v50 = vadd.f32 %v2877_v32, %v1806_v52 }
 0x3f5   : > { %1587 = vst [vmem:[#allocation6 + $0x60] sm:$0xff] %v1554_v2  ;;  %1588 = vst [vmem:[#allocation6 + $0x68] sm:$0xff] %v1555_v25  ;;  %v1568_v12 = vadd.f32 %v2881_v39, %v1806_v52  ;;  %v1569_v0 = vadd.f32 %v2885_v48, %v1806_v52  ;;  %v1570_v3 = vadd.f32 %v2889_v10, %v1806_v52 }
 0x3f6   : > { %1589 = vst [vmem:[#allocation6 + $0x70] sm:$0xff] %v1556_v6  ;;  %1590 = vst [vmem:[#allocation6 + $0x78] sm:$0xff] %v1557_v31  ;;  %v1571_v20 = vadd.f32 %v2893_v24, %v1806_v52  ;;  %v1572_v7 = vadd.f32 %v2897_v26, %v1806_v52  ;;  %v1573_v56 = vadd.f32 %v2901_v30, %v1806_v52 }
 0x3f7   : > { %1591 = vst [vmem:[#allocation6 + $0x80] sm:$0xff] %v1558_v47  ;;  %1592 = vst [vmem:[#allocation6 + $0x88] sm:$0xff] %v1559_v63 }
 0x3f8   : > { %1593 = vst [vmem:[#allocation6 + $0x90] sm:$0xff] %v1560_v37  ;;  %1594 = vst [vmem:[#allocation6 + $0x98] sm:$0xff] %v1561_v46 }
 0x3f9   : > { %1595 = vst [vmem:[#allocation6 + $0xa0] sm:$0xff] %v1562_v13  ;;  %1596 = vst [vmem:[#allocation6 + $0xa8] sm:$0xff] %v1563_v17 }
 0x3fa   : > { %1597 = vst [vmem:[#allocation6 + $0xb0] sm:$0xff] %v1564_v19  ;;  %1598 = vst [vmem:[#allocation6 + $0xb8] sm:$0xff] %v1565_v4 }
 0x3fb   : > { %1599 = vst [vmem:[#allocation6 + $0xc0] sm:$0xff] %v1566_v43  ;;  %1600 = vst [vmem:[#allocation6 + $0xc8] sm:$0xff] %v1567_v50 }
 0x3fc   : > { %1601 = vst [vmem:[#allocation6 + $0xd0] sm:$0xff] %v1568_v12  ;;  %1602 = vst [vmem:[#allocation6 + $0xd8] sm:$0xff] %v1569_v0 }
 0x3fd   : > { %1603 = vst [vmem:[#allocation6 + $0xe0] sm:$0xff] %v1570_v3  ;;  %1604 = vst [vmem:[#allocation6 + $0xe8] sm:$0xff] %v1571_v20 }
 0x3fe   : > { %1605 = vst [vmem:[#allocation6 + $0xf0] sm:$0xff] %v1572_v7  ;;  %1606 = vst [vmem:[#allocation6 + $0xf8] sm:$0xff] %v1573_v56 }
 0x3ff PF: > { %p2977_p7 = scmp.eq.s32.totalorder %s1680_s21, 2  ;;  %s2277_s24 = smov [#allocation6]  }
 0x400   : > { %s1613_s25 = sshll.u32 %s2277_s24, 4  ;;  %s1614_s25 = int_to_ptr.vmem [resolvable:$true] %s1613_s25 }
 0x401   : > { %s2216_s26 = scalar_lea.vmem %s1614_s25, 4096  ;;  %p2223_p6 = scmp.lt.s32.totalorder %s1614_s25, %s1614_s25 }
 0x402   : > { %p2217_p9 = scmp.ne.s32.totalorder %s1614_s25, %s2216_s26  ;;  %p2224_p8 = scmp.lt.s32.totalorder %s2216_s26, %s2216_s26 }
 0x404   : > { %p2218_p3 = pnand %p2217_p9, %p2977_p7  ;;  %p2225_p10 = por %p2224_p8, %p2223_p6 }
 0x406   : > { %p2219_p4 = pneg %p2218_p3 }
 0x408   : > { %p2226_p11 = pnand %p2225_p10, %p2219_p4 }
 0x40a   : > { %2229 = shalt.err (!%p2226_p11)
}
 0x40b   : > { %s2230_s21 = scalar_lea.hbm %s3017_s5, 4096 }
 0x40c   : > { %p2231_p12 = scmp.ne.s32.totalorder %s3017_s5, %s2230_s21  ;;  %p2236_p1 = scmp.lt.u32.totalorder %s2230_s21, %s3017_s5 }
 0x40e   : > { %p2232_p13 = pnand %p2231_p12, %p2977_p7 }
 0x410   : > { %p2233_p0 = pneg %p2232_p13 }
 0x412   : > { %p2238_p2 = pnand %p2236_p1, %p2233_p0 }
 0x414   : > { %2241 = shalt.err (!%p2238_p2)
}
 0x415   : > { %s2278_s8 = smov 128   ;;  %s2279_s9 = smov 8  }
 0x416   : > { %2129 = dma.vmem_to_hbm [thread:$0]  (%p2977_p7), %s1614_s25, 4096, %s3017_s5, [#allocation5], %s2278_s8, %s2278_s8, %s2279_s9  }
 0x417   : > { %2259 = dma.done.wait (%p2977_p7), [#allocation5], 4096  }
 0x418   : > { %2261 = vsyncadd (%p2977_p7), [#allocation5], 4294963200 }
 0x419 PF: > { %s17_s20 = sadd.s32 1, %s2272_s20   ;;  %s3091_s18 = smov %s2268_s19 }
 0x41a   : > { %p14_p5 = scmp.ge.s32.totalorder %s17_s20, 5   ;;  %s3092_s19 = smov %s3094_s22 }
 0x41c   :  { %16 = sbr.rel (!%p14_p5) target bundleno = 3 (0x3), region = 99 }
 0x423   :  { %1629 = vsyncpa [#allocation4], 1 }
 0x424   :  { %1631 = vsyncpa [#allocation4 + $0x1], 1 }
 0x425   :  { %1632 = vsyncpa [#allocation5], 1 }
 0x426   :  { %1634 = vsyncpa [#allocation5 + $0x1], 1 }

</bundles_post_ra>
